<compile_context>
chip_gen: v7x
topology: tpu7x:2x2x1
jax: 0.10.0
libtpu: 0.0.40
codegen_flags: <defaults>
</compile_context>

<pallas_src>
import jax
import jax.numpy as jnp
from jax.experimental import pallas as pl
from jax.experimental.pallas import tpu as pltpu


def _round_up(x, m):
    return (x + m - 1) // m * m


# --------------------------------------------------------------------------
# Kernel
# --------------------------------------------------------------------------
def _cnn_fused_kernel(emb_ref, w_all_ref, b_all_ref, mask_ref,
                      fc_w_ref, fc_b_ref, out_ref):
    tb, s, e = emb_ref.shape
    max_fs, _, c_pad = w_all_ref.shape
    n_rows = tb * s

    # Per-tap matmul-accumulate (bf16 MXU inputs, f32 accumulation):
    #   acc[b*S + l, :] = sum_o (emb[b, l+o, :] @ W_o)
    # The "+o" row shift is realized by rolling the f32 per-tap product with
    # pltpu.roll (XLU); rows that wrap across tile/batch boundaries only land
    # on time positions the validity mask zeroes out below.
    emb2d = emb_ref[...].reshape(n_rows, e)
    acc = jnp.dot(emb2d, w_all_ref[0], preferred_element_type=jnp.float32)
    for o in range(1, max_fs):
        y_o = jnp.dot(emb2d, w_all_ref[o], preferred_element_type=jnp.float32)
        # row i of the rolled result = row (i + o) mod n_rows of y_o
        acc = acc + pltpu.roll(y_o, shift=n_rows - o, axis=0)
    acc = acc.reshape(tb, s, c_pad)

    # Bias + ReLU in f32, then zero invalid time positions / pad lanes
    # (0-fill is only valid because post-ReLU values are >= 0; if the
    # activation ever changes, the fill must become -inf), then max over time.
    acc = jnp.maximum(acc + b_all_ref[...][None], 0.0)
    acc = acc * mask_ref[...][None]
    pooled = jnp.max(acc, axis=1)                              # [TB, Cp]

    # Dropout is identity at inference; final lane-padded linear on the MXU.
    out = jnp.dot(pooled.astype(fc_w_ref.dtype), fc_w_ref[...],
                  preferred_element_type=jnp.float32) + fc_b_ref[...]
    out_ref[...] = out.astype(out_ref.dtype)


# --------------------------------------------------------------------------
# VMEM budgeting / batch-tile selection
# --------------------------------------------------------------------------
def _vmem_capacity_bytes():
    try:
        cap = int(pltpu.get_tpu_info().vmem_capacity_bytes)
        if cap > 0:
            return cap
    except Exception:
        pass
    return 64 * 1024 * 1024   # conservative default (v7x per-core VMEM)


def _pick_batch_tile(batch, seq_len, emb_dim, c_pad, out_pad, max_fs, *,
                     emb_bytes, w_bytes, budget_bytes, weight_buffers=2,
                     prefer_multi_step=True):
    """Largest batch tile whose VMEM footprint fits `budget_bytes`.

    Accounting: only the emb input tile and the small output tile are
    double-buffered by the BlockSpec pipeline; acc / per-tap-product
    temporaries are single-buffered; resident weights are counted separately.
    `prefer_multi_step` keeps the grid >= 2 so the "parallel" batch axis can
    shard across both TensorCores on v7x.
    """
    weight_bytes = weight_buffers * (
        max_fs * emb_dim * c_pad * w_bytes        # w_all
        + c_pad * out_pad * w_bytes               # fc_w
        + (seq_len + 1) * c_pad * 4               # mask + b_all (f32)
        + out_pad * 4)                            # fc_b (f32)
    per_row = (2 * seq_len * emb_dim * emb_bytes  # emb tile, double-buffered
               + 2 * out_pad * 4                  # out tile, double-buffered
               + 2 * seq_len * c_pad * 4          # acc + rolled per-tap product
               + seq_len * emb_dim * emb_bytes)   # flattened emb value
    avail = budget_bytes - weight_bytes
    tb_cap = max(avail // per_row, 1) if avail > 0 else 1

    divisors = [t for t in range(1, batch + 1) if batch % t == 0]
    cap = min(tb_cap, batch // 2) if (prefer_multi_step and batch >= 2) else tb_cap
    cands = [t for t in divisors if t <= cap] or [1]
    best = max(cands)
    for t in sorted(cands, reverse=True):         # prefer 8-row-aligned tiles
        if t % 8 == 0:
            best = t
            break
    return best


# --------------------------------------------------------------------------
# pallas_call wrapper
# --------------------------------------------------------------------------
def _call_kernel(embedded, fused, batch_tile, grid, vmem_limit_bytes,
                 single_buffer_weights):
    b, s, e = embedded.shape
    c_pad, out_pad, max_fs = fused["c_pad"], fused["out_pad"], fused["max_fs"]

    def wspec(shape):
        idx = lambda i, _nd=len(shape): (0,) * _nd
        if single_buffer_weights:
            # Constant blocks don't need double buffers -> halve their residency.
            return pl.BlockSpec(shape, idx, pipeline_mode=pl.Buffered(1))
        return pl.BlockSpec(shape, idx)

    return pl.pallas_call(
        _cnn_fused_kernel,
        out_shape=jax.ShapeDtypeStruct((b, out_pad), jnp.float32),
        grid_spec=pltpu.PrefetchScalarGridSpec(
            num_scalar_prefetch=0,
            grid=grid,
            in_specs=[
                pl.BlockSpec((batch_tile, s, e), lambda i: (i, 0, 0)),
                wspec((max_fs, e, c_pad)),     # fused conv weights (bf16)
                wspec((1, c_pad)),             # conv biases (f32)
                wspec((s, c_pad)),             # validity mask (f32 0/1)
                wspec((c_pad, out_pad)),       # fc weights (bf16)
                wspec((1, out_pad)),           # fc bias (f32)
            ],
            out_specs=pl.BlockSpec((batch_tile, out_pad), lambda i: (i, 0)),
        ),
        compiler_params=pltpu.CompilerParams(
            dimension_semantics=("parallel",),
            vmem_limit_bytes=vmem_limit_bytes),
    )(embedded, fused["w_all"], fused["b_all"], fused["mask"],
      fused["fc_w"], fused["fc_b"])


def cnn_forward(text, params, fused, *, batch_tile=None):
    """text: [seq_len, batch] int32 token ids (same convention as the PyTorch module)."""
    compute_dtype = fused["w_all"].dtype
    # text.permute(1, 0) -> [batch, seq_len]; embedding lookup stays outside
    # the kernel for now (glue gather), streamed to the kernel as bf16.
    embedded = jnp.take(params["embedding"], text.T, axis=0).astype(compute_dtype)

    b, s, e = embedded.shape
    c_pad, out_pad, max_fs = fused["c_pad"], fused["out_pad"], fused["max_fs"]

    vmem_cap = _vmem_capacity_bytes()
    budget = min(int(vmem_cap * 0.4), 40 * 1024 * 1024)   # ~40MiB v5e/v6e, ~25MiB v7x
    if batch_tile is None:
        itemsize = jnp.dtype(compute_dtype).itemsize
        batch_tile = _pick_batch_tile(
            b, s, e, c_pad, out_pad, max_fs,
            emb_bytes=itemsize, w_bytes=itemsize, budget_bytes=budget)
    assert b % batch_tile == 0, "batch must be divisible by batch_tile"
    grid = (b // batch_tile,)
    vmem_limit = min(max(int(vmem_cap * 0.75), budget), vmem_cap)

    try:
        out_full = _call_kernel(embedded, fused, batch_tile, grid, vmem_limit,
                                single_buffer_weights=True)
    except Exception:
        # pipeline_mode=pl.Buffered(1) not supported here -> default buffering.
        out_full = _call_kernel(embedded, fused, batch_tile, grid, vmem_limit,
                                single_buffer_weights=False)
    return out_full[:, :fused["out_dim"]]


# --------------------------------------------------------------------------
# Parameter construction / packing
# --------------------------------------------------------------------------
def init_params(key, vocab_size, embedding_dim, n_filters, filter_sizes,
                output_dim, pad_idx):
    n_fs = len(filter_sizes)
    keys = jax.random.split(key, 1 + 2 * n_fs + 2)

    emb = jax.random.normal(keys[0], (vocab_size, embedding_dim), jnp.float32) * 0.1
    emb = emb.at[pad_idx].set(0.0)          # nn.Embedding zero-inits the pad row

    conv_w, conv_b = [], []
    for i, fs in enumerate(filter_sizes):
        # PyTorch Conv2d weight: [n_filters, in_ch=1, fs, emb_dim]
        w = jax.random.normal(keys[1 + i],
                              (n_filters, 1, fs, embedding_dim), jnp.float32) * 0.1
        conv_w.append(jnp.transpose(w[:, 0], (1, 2, 0)))      # -> [fs, E, nf]
        b = jax.random.normal(keys[1 + n_fs + i], (n_filters,), jnp.float32) * 0.1
        conv_b.append(b.reshape(1, n_filters))

    fc_in = n_fs * n_filters
    fc_w = jax.random.normal(keys[-2], (output_dim, fc_in), jnp.float32) * 0.1
    fc_b = jax.random.normal(keys[-1], (output_dim,), jnp.float32) * 0.1
    return {
        "embedding": emb,
        "conv_w": conv_w,
        "conv_b": conv_b,
        "fc_w": fc_w.T,                      # [fc_in, output_dim]
        "fc_b": fc_b.reshape(1, output_dim),
    }


def pack_fused_params(params, filter_sizes, seq_len, compute_dtype=jnp.bfloat16):
    """Pack per-filter conv weights into a lane-padded per-tap weight stack."""
    n_fs = len(filter_sizes)
    max_fs = max(filter_sizes)
    assert seq_len >= max_fs, "seq_len must be >= max(filter_sizes)"

    emb_dim = params["embedding"].shape[1]
    nf = params["conv_b"][0].shape[-1]
    c_tot = n_fs * nf
    c_pad = _round_up(c_tot, 128)
    out_dim = params["fc_w"].shape[-1]
    out_pad = _round_up(out_dim, 128)

    w_all = jnp.zeros((max_fs, emb_dim, c_pad), jnp.float32)   # [tap, E, Cp]
    b_all = jnp.zeros((1, c_pad), jnp.float32)
    mask = jnp.zeros((seq_len, c_pad), jnp.float32)            # f32 0/1 validity
    for i, fs in enumerate(filter_sizes):
        lo = i * nf
        w_all = w_all.at[:fs, :, lo:lo + nf].set(params["conv_w"][i])
        b_all = b_all.at[:, lo:lo + nf].set(params["conv_b"][i])
        mask = mask.at[:seq_len - fs + 1, lo:lo + nf].set(1.0)

    fc_w = jnp.zeros((c_pad, out_pad), jnp.float32)
    fc_w = fc_w.at[:c_tot, :out_dim].set(params["fc_w"])
    fc_b = jnp.zeros((1, out_pad), jnp.float32)
    fc_b = fc_b.at[:, :out_dim].set(params["fc_b"])

    return {
        "w_all": w_all.astype(compute_dtype),   # MXU input dtype
        "b_all": b_all,                         # f32 epilogue
        "mask": mask,                           # f32 epilogue
        "fc_w": fc_w.astype(compute_dtype),     # MXU input dtype
        "fc_b": fc_b,                           # f32 epilogue
        "c_pad": c_pad, "out_pad": out_pad,
        "out_dim": out_dim, "max_fs": max_fs,
    }


# --------------------------------------------------------------------------
# Pure-JAX reference (mirrors PyTorch semantics) for verification
# --------------------------------------------------------------------------
def _reference(text, params, filter_sizes, input_dtype=jnp.float32):
    """`input_dtype=bf16` models the kernel's MXU input quantization
    (bf16 inputs, f32 accumulation); f32 is the exact PyTorch-equivalent math."""
    def q(x):
        return x.astype(input_dtype).astype(jnp.float32)

    embedded = jnp.take(q(params["embedding"]), text.T, axis=0)    # [B, S, E]
    B, S, _ = embedded.shape
    pooled = []
    for i, fs in enumerate(filter_sizes):
        w = q(params["conv_w"][i])
        bvec = params["conv_b"][i][0]
        L = S - fs + 1
        acc = jnp.zeros((B, L, w.shape[-1]), jnp.float32)
        for o in range(fs):
            acc = acc + jnp.einsum("ble,ef->blf", embedded[:, o:o + L, :], w[o])
        acc = jax.nn.relu(acc + bvec[None, None, :])
        pooled.append(jnp.max(acc, axis=1))
    cat = q(jnp.concatenate(pooled, axis=-1))
    return cat @ q(params["fc_w"]) + params["fc_b"][0][None, :]


if __name__ == "__main__":
    # Small, self-consistent shapes (batch chosen so the grid has 2 steps).
    vocab_size = 64
    embedding_dim = 32
    n_filters = 8
    filter_sizes = [3, 4, 5]
    output_dim = 4
    pad_idx = 0
    seq_len, batch = 16, 16

    key = jax.random.PRNGKey(0)
    pkey, tkey = jax.random.split(key)
    params = init_params(pkey, vocab_size, embedding_dim, n_filters,
                         filter_sizes, output_dim, pad_idx)
    fused = pack_fused_params(params, filter_sizes, seq_len,
                              compute_dtype=jnp.bfloat16)

    # text follows the PyTorch module's [seq_len, batch] convention.
    text = jax.random.randint(tkey, (seq_len, batch), 0, vocab_size,
                              dtype=jnp.int32)

    out = cnn_forward(text, params, fused)          # auto-picked batch tile (grid >= 2)
    out = jax.block_until_ready(out)

    ref_bf16 = _reference(text, params, filter_sizes, input_dtype=jnp.bfloat16)
    ref_f32 = _reference(text, params, filter_sizes, input_dtype=jnp.float32)
    assert out.shape == (batch, output_dim)
    assert jnp.allclose(out, ref_bf16, atol=5e-3, rtol=5e-3), \
        f"mismatch vs bf16-input reference: {jnp.max(jnp.abs(out - ref_bf16))}"
    assert jnp.allclose(out, ref_f32, atol=2.5e-2, rtol=2.5e-2), \
        f"mismatch vs f32 reference: {jnp.max(jnp.abs(out - ref_f32))}"
    print("KERNEL_OK")
</pallas_src>

<mosaic_0001>
module attributes {stable_mosaic.version = 11 : i64} {
  func.func @_cnn_fused_kernel(%arg0: i32, %arg1: memref<8x16x32xbf16, #tpu.memory_space<vmem>>, %arg2: memref<5x32x128xbf16, #tpu.memory_space<vmem>>, %arg3: memref<1x128xf32, #tpu.memory_space<vmem>>, %arg4: memref<16x128xf32, #tpu.memory_space<vmem>>, %arg5: memref<128x128xbf16, #tpu.memory_space<vmem>>, %arg6: memref<1x128xf32, #tpu.memory_space<vmem>>, %arg7: memref<8x128xf32, #tpu.memory_space<vmem>>) attributes {dimension_semantics = [#tpu.dimension_semantics<parallel>], iteration_bounds = array<i64: 2>, scalar_prefetch = 0 : i64, scratch_operands = 0 : i64, tpu.core_type = #tpu.core_type<tc>, window_params = [{transform_indices = @transform_0, window_bounds = array<i64: 8, 16, 32>}, {pipeline_mode = #tpu.pipeline_mode<synchronous>, transform_indices = @transform_1, window_bounds = array<i64: 5, 32, 128>}, {pipeline_mode = #tpu.pipeline_mode<synchronous>, transform_indices = @transform_2, window_bounds = array<i64: 1, 128>}, {pipeline_mode = #tpu.pipeline_mode<synchronous>, transform_indices = @transform_3, window_bounds = array<i64: 16, 128>}, {pipeline_mode = #tpu.pipeline_mode<synchronous>, transform_indices = @transform_4, window_bounds = array<i64: 128, 128>}, {pipeline_mode = #tpu.pipeline_mode<synchronous>, transform_indices = @transform_5, window_bounds = array<i64: 1, 128>}, {transform_indices = @transform_6, window_bounds = array<i64: 8, 128>}]} {
    %c0 = arith.constant 0 : index
    %c0_0 = arith.constant 0 : index
    %c0_1 = arith.constant 0 : index
    %0 = vector.load %arg1[%c0, %c0_0, %c0_1] : memref<8x16x32xbf16, #tpu.memory_space<vmem>>, vector<8x16x32xbf16>
    %1 = vector.shape_cast %0 : vector<8x16x32xbf16> to vector<128x32xbf16>
    %c0_2 = arith.constant 0 : index
    %c0_3 = arith.constant 0 : index
    %c0_4 = arith.constant 0 : index
    %2 = vector.load %arg2[%c0_2, %c0_3, %c0_4] : memref<5x32x128xbf16, #tpu.memory_space<vmem>>, vector<1x32x128xbf16>
    %3 = vector.shape_cast %2 : vector<1x32x128xbf16> to vector<32x128xbf16>
    %cst = arith.constant dense<0.000000e+00> : vector<128x128xf32>
    %4 = tpu.matmul %1, %3, %cst {dimension_numbers = #tpu.dot_dimension_numbers<[1], [0], [0], [1], [0, 0, 1, 1], [], []>} : vector<128x32xbf16>, vector<32x128xbf16>, vector<128x128xf32> -> vector<128x128xf32>
    %c1 = arith.constant 1 : index
    %c0_5 = arith.constant 0 : index
    %c0_6 = arith.constant 0 : index
    %5 = vector.load %arg2[%c1, %c0_5, %c0_6] : memref<5x32x128xbf16, #tpu.memory_space<vmem>>, vector<1x32x128xbf16>
    %6 = vector.shape_cast %5 : vector<1x32x128xbf16> to vector<32x128xbf16>
    %cst_7 = arith.constant dense<0.000000e+00> : vector<128x128xf32>
    %7 = tpu.matmul %1, %6, %cst_7 {dimension_numbers = #tpu.dot_dimension_numbers<[1], [0], [0], [1], [0, 0, 1, 1], [], []>} : vector<128x32xbf16>, vector<32x128xbf16>, vector<128x128xf32> -> vector<128x128xf32>
    %c127_i32 = arith.constant 127 : i32
    %8 = tpu.dynamic_rotate %7 by %c127_i32 dim 0 : vector<128x128xf32>, i32 -> vector<128x128xf32>
    %9 = arith.addf %4, %8 : vector<128x128xf32>
    %c2 = arith.constant 2 : index
    %c0_8 = arith.constant 0 : index
    %c0_9 = arith.constant 0 : index
    %10 = vector.load %arg2[%c2, %c0_8, %c0_9] : memref<5x32x128xbf16, #tpu.memory_space<vmem>>, vector<1x32x128xbf16>
    %11 = vector.shape_cast %10 : vector<1x32x128xbf16> to vector<32x128xbf16>
    %cst_10 = arith.constant dense<0.000000e+00> : vector<128x128xf32>
    %12 = tpu.matmul %1, %11, %cst_10 {dimension_numbers = #tpu.dot_dimension_numbers<[1], [0], [0], [1], [0, 0, 1, 1], [], []>} : vector<128x32xbf16>, vector<32x128xbf16>, vector<128x128xf32> -> vector<128x128xf32>
    %c126_i32 = arith.constant 126 : i32
    %13 = tpu.dynamic_rotate %12 by %c126_i32 dim 0 : vector<128x128xf32>, i32 -> vector<128x128xf32>
    %14 = arith.addf %9, %13 : vector<128x128xf32>
    %c3 = arith.constant 3 : index
    %c0_11 = arith.constant 0 : index
    %c0_12 = arith.constant 0 : index
    %15 = vector.load %arg2[%c3, %c0_11, %c0_12] : memref<5x32x128xbf16, #tpu.memory_space<vmem>>, vector<1x32x128xbf16>
    %16 = vector.shape_cast %15 : vector<1x32x128xbf16> to vector<32x128xbf16>
    %cst_13 = arith.constant dense<0.000000e+00> : vector<128x128xf32>
    %17 = tpu.matmul %1, %16, %cst_13 {dimension_numbers = #tpu.dot_dimension_numbers<[1], [0], [0], [1], [0, 0, 1, 1], [], []>} : vector<128x32xbf16>, vector<32x128xbf16>, vector<128x128xf32> -> vector<128x128xf32>
    %c125_i32 = arith.constant 125 : i32
    %18 = tpu.dynamic_rotate %17 by %c125_i32 dim 0 : vector<128x128xf32>, i32 -> vector<128x128xf32>
    %19 = arith.addf %14, %18 : vector<128x128xf32>
    %c4 = arith.constant 4 : index
    %c0_14 = arith.constant 0 : index
    %c0_15 = arith.constant 0 : index
    %20 = vector.load %arg2[%c4, %c0_14, %c0_15] : memref<5x32x128xbf16, #tpu.memory_space<vmem>>, vector<1x32x128xbf16>
    %21 = vector.shape_cast %20 : vector<1x32x128xbf16> to vector<32x128xbf16>
    %cst_16 = arith.constant dense<0.000000e+00> : vector<128x128xf32>
    %22 = tpu.matmul %1, %21, %cst_16 {dimension_numbers = #tpu.dot_dimension_numbers<[1], [0], [0], [1], [0, 0, 1, 1], [], []>} : vector<128x32xbf16>, vector<32x128xbf16>, vector<128x128xf32> -> vector<128x128xf32>
    %c124_i32 = arith.constant 124 : i32
    %23 = tpu.dynamic_rotate %22 by %c124_i32 dim 0 : vector<128x128xf32>, i32 -> vector<128x128xf32>
    %24 = arith.addf %19, %23 : vector<128x128xf32>
    %25 = vector.shape_cast %24 : vector<128x128xf32> to vector<8x16x128xf32>
    %c0_17 = arith.constant 0 : index
    %c0_18 = arith.constant 0 : index
    %26 = vector.load %arg3[%c0_17, %c0_18] : memref<1x128xf32, #tpu.memory_space<vmem>>, vector<1x128xf32>
    %27 = vector.shape_cast %26 : vector<1x128xf32> to vector<1x1x128xf32>
    %28 = vector.broadcast %27 : vector<1x1x128xf32> to vector<8x16x128xf32>
    %29 = arith.addf %25, %28 : vector<8x16x128xf32>
    %cst_19 = arith.constant 0.000000e+00 : f32
    %30 = vector.broadcast %cst_19 : f32 to vector<8x16x128xf32>
    %31 = arith.maximumf %29, %30 : vector<8x16x128xf32>
    %c0_20 = arith.constant 0 : index
    %c0_21 = arith.constant 0 : index
    %32 = vector.load %arg4[%c0_20, %c0_21] : memref<16x128xf32, #tpu.memory_space<vmem>>, vector<16x128xf32>
    %33 = vector.shape_cast %32 : vector<16x128xf32> to vector<1x16x128xf32>
    %34 = vector.broadcast %33 : vector<1x16x128xf32> to vector<8x16x128xf32>
    %35 = arith.mulf %31, %34 : vector<8x16x128xf32>
    %cst_22 = arith.constant dense<0xFF800000> : vector<8x128xf32>
    %36 = vector.multi_reduction <maximumf>, %35, %cst_22 [1] : vector<8x16x128xf32> to vector<8x128xf32>
    %37 = arith.truncf %36 : vector<8x128xf32> to vector<8x128xbf16>
    %c0_23 = arith.constant 0 : index
    %c0_24 = arith.constant 0 : index
    %38 = vector.load %arg5[%c0_23, %c0_24] : memref<128x128xbf16, #tpu.memory_space<vmem>>, vector<128x128xbf16>
    %cst_25 = arith.constant dense<0.000000e+00> : vector<8x128xf32>
    %39 = tpu.matmul %37, %38, %cst_25 {dimension_numbers = #tpu.dot_dimension_numbers<[1], [0], [0], [1], [0, 0, 1, 1], [], []>} : vector<8x128xbf16>, vector<128x128xbf16>, vector<8x128xf32> -> vector<8x128xf32>
    %c0_26 = arith.constant 0 : index
    %c0_27 = arith.constant 0 : index
    %40 = vector.load %arg6[%c0_26, %c0_27] : memref<1x128xf32, #tpu.memory_space<vmem>>, vector<1x128xf32>
    %41 = vector.broadcast %40 : vector<1x128xf32> to vector<8x128xf32>
    %42 = arith.addf %39, %41 : vector<8x128xf32>
    %c0_28 = arith.constant 0 : index
    %c0_29 = arith.constant 0 : index
    %43 = vector.load %arg7[%c0_28, %c0_29] : memref<8x128xf32, #tpu.memory_space<vmem>>, vector<8x128xf32>
    tpu.vector_store %arg7[%c0_28, %c0_29], %42 {strides = array<i32>} : memref<8x128xf32, #tpu.memory_space<vmem>>, vector<8x128xf32>,
    return
  }
  func.func @transform_0(%arg0: i32) -> (i32, i32, i32) {
    %c0_i32 = arith.constant 0 : i32
    %c0_i32_0 = arith.constant 0 : i32
    %c0_i32_1 = arith.constant 0 : i32
    return %arg0, %c0_i32, %c0_i32_0 : i32, i32, i32
  }
  func.func @transform_1(%arg0: i32) -> (i32, i32, i32) {
    %c0_i32 = arith.constant 0 : i32
    %c0_i32_0 = arith.constant 0 : i32
    %c0_i32_1 = arith.constant 0 : i32
    %c0_i32_2 = arith.constant 0 : i32
    return %c0_i32, %c0_i32_0, %c0_i32_1 : i32, i32, i32
  }
  func.func @transform_2(%arg0: i32) -> (i32, i32) {
    %c0_i32 = arith.constant 0 : i32
    %c0_i32_0 = arith.constant 0 : i32
    %c0_i32_1 = arith.constant 0 : i32
    return %c0_i32, %c0_i32_0 : i32, i32
  }
  func.func @transform_3(%arg0: i32) -> (i32, i32) {
    %c0_i32 = arith.constant 0 : i32
    %c0_i32_0 = arith.constant 0 : i32
    %c0_i32_1 = arith.constant 0 : i32
    return %c0_i32, %c0_i32_0 : i32, i32
  }
  func.func @transform_4(%arg0: i32) -> (i32, i32) {
    %c0_i32 = arith.constant 0 : i32
    %c0_i32_0 = arith.constant 0 : i32
    %c0_i32_1 = arith.constant 0 : i32
    return %c0_i32, %c0_i32_0 : i32, i32
  }
  func.func @transform_5(%arg0: i32) -> (i32, i32) {
    %c0_i32 = arith.constant 0 : i32
    %c0_i32_0 = arith.constant 0 : i32
    %c0_i32_1 = arith.constant 0 : i32
    return %c0_i32, %c0_i32_0 : i32, i32
  }
  func.func @transform_6(%arg0: i32) -> (i32, i32) {
    %c0_i32 = arith.constant 0 : i32
    %c0_i32_0 = arith.constant 0 : i32
    return %arg0, %c0_i32 : i32, i32
  }
}

module attributes {stable_mosaic.version = 11 : i64} {
  func.func @_cnn_fused_kernel(%arg0: i32, %arg1: memref<8x16x32xbf16, #tpu.memory_space<vmem>>, %arg2: memref<5x32x128xbf16, #tpu.memory_space<vmem>>, %arg3: memref<1x128xf32, #tpu.memory_space<vmem>>, %arg4: memref<16x128xf32, #tpu.memory_space<vmem>>, %arg5: memref<128x128xbf16, #tpu.memory_space<vmem>>, %arg6: memref<1x128xf32, #tpu.memory_space<vmem>>, %arg7: memref<8x128xf32, #tpu.memory_space<vmem>>) attributes {dimension_semantics = [#tpu.dimension_semantics<parallel>], iteration_bounds = array<i64: 2>, scalar_prefetch = 0 : i64, scratch_operands = 0 : i64, tpu.core_type = #tpu.core_type<tc>, window_params = [{transform_indices = @transform_0, window_bounds = array<i64: 8, 16, 32>}, {pipeline_mode = #tpu.pipeline_mode<synchronous>, transform_indices = @transform_1, window_bounds = array<i64: 5, 32, 128>}, {pipeline_mode = #tpu.pipeline_mode<synchronous>, transform_indices = @transform_2, window_bounds = array<i64: 1, 128>}, {pipeline_mode = #tpu.pipeline_mode<synchronous>, transform_indices = @transform_3, window_bounds = array<i64: 16, 128>}, {pipeline_mode = #tpu.pipeline_mode<synchronous>, transform_indices = @transform_4, window_bounds = array<i64: 128, 128>}, {pipeline_mode = #tpu.pipeline_mode<synchronous>, transform_indices = @transform_5, window_bounds = array<i64: 1, 128>}, {transform_indices = @transform_6, window_bounds = array<i64: 8, 128>}]} {
    %c0 = arith.constant 0 : index
    %c0_0 = arith.constant 0 : index
    %c0_1 = arith.constant 0 : index
    %0 = vector.load %arg1[%c0, %c0_0, %c0_1] : memref<8x16x32xbf16, #tpu.memory_space<vmem>>, vector<8x16x32xbf16>
    %1 = vector.shape_cast %0 : vector<8x16x32xbf16> to vector<128x32xbf16>
    %c0_2 = arith.constant 0 : index
    %c0_3 = arith.constant 0 : index
    %c0_4 = arith.constant 0 : index
    %2 = vector.load %arg2[%c0_2, %c0_3, %c0_4] : memref<5x32x128xbf16, #tpu.memory_space<vmem>>, vector<1x32x128xbf16>
    %3 = vector.shape_cast %2 : vector<1x32x128xbf16> to vector<32x128xbf16>
    %cst = arith.constant dense<0.000000e+00> : vector<128x128xf32>
    %4 = tpu.matmul %1, %3, %cst {dimension_numbers = #tpu.dot_dimension_numbers<[1], [0], [0], [1], [0, 0, 1, 1], [], []>} : vector<128x32xbf16>, vector<32x128xbf16>, vector<128x128xf32> -> vector<128x128xf32>
    %c1 = arith.constant 1 : index
    %c0_5 = arith.constant 0 : index
    %c0_6 = arith.constant 0 : index
    %5 = vector.load %arg2[%c1, %c0_5, %c0_6] : memref<5x32x128xbf16, #tpu.memory_space<vmem>>, vector<1x32x128xbf16>
    %6 = vector.shape_cast %5 : vector<1x32x128xbf16> to vector<32x128xbf16>
    %cst_7 = arith.constant dense<0.000000e+00> : vector<128x128xf32>
    %7 = tpu.matmul %1, %6, %cst_7 {dimension_numbers = #tpu.dot_dimension_numbers<[1], [0], [0], [1], [0, 0, 1, 1], [], []>} : vector<128x32xbf16>, vector<32x128xbf16>, vector<128x128xf32> -> vector<128x128xf32>
    %c127_i32 = arith.constant 127 : i32
    %8 = tpu.dynamic_rotate %7 by %c127_i32 dim 0 : vector<128x128xf32>, i32 -> vector<128x128xf32>
    %9 = arith.addf %4, %8 : vector<128x128xf32>
    %c2 = arith.constant 2 : index
    %c0_8 = arith.constant 0 : index
    %c0_9 = arith.constant 0 : index
    %10 = vector.load %arg2[%c2, %c0_8, %c0_9] : memref<5x32x128xbf16, #tpu.memory_space<vmem>>, vector<1x32x128xbf16>
    %11 = vector.shape_cast %10 : vector<1x32x128xbf16> to vector<32x128xbf16>
    %cst_10 = arith.constant dense<0.000000e+00> : vector<128x128xf32>
    %12 = tpu.matmul %1, %11, %cst_10 {dimension_numbers = #tpu.dot_dimension_numbers<[1], [0], [0], [1], [0, 0, 1, 1], [], []>} : vector<128x32xbf16>, vector<32x128xbf16>, vector<128x128xf32> -> vector<128x128xf32>
    %c126_i32 = arith.constant 126 : i32
    %13 = tpu.dynamic_rotate %12 by %c126_i32 dim 0 : vector<128x128xf32>, i32 -> vector<128x128xf32>
    %14 = arith.addf %9, %13 : vector<128x128xf32>
    %c3 = arith.constant 3 : index
    %c0_11 = arith.constant 0 : index
    %c0_12 = arith.constant 0 : index
    %15 = vector.load %arg2[%c3, %c0_11, %c0_12] : memref<5x32x128xbf16, #tpu.memory_space<vmem>>, vector<1x32x128xbf16>
    %16 = vector.shape_cast %15 : vector<1x32x128xbf16> to vector<32x128xbf16>
    %cst_13 = arith.constant dense<0.000000e+00> : vector<128x128xf32>
    %17 = tpu.matmul %1, %16, %cst_13 {dimension_numbers = #tpu.dot_dimension_numbers<[1], [0], [0], [1], [0, 0, 1, 1], [], []>} : vector<128x32xbf16>, vector<32x128xbf16>, vector<128x128xf32> -> vector<128x128xf32>
    %c125_i32 = arith.constant 125 : i32
    %18 = tpu.dynamic_rotate %17 by %c125_i32 dim 0 : vector<128x128xf32>, i32 -> vector<128x128xf32>
    %19 = arith.addf %14, %18 : vector<128x128xf32>
    %c4 = arith.constant 4 : index
    %c0_14 = arith.constant 0 : index
    %c0_15 = arith.constant 0 : index
    %20 = vector.load %arg2[%c4, %c0_14, %c0_15] : memref<5x32x128xbf16, #tpu.memory_space<vmem>>, vector<1x32x128xbf16>
    %21 = vector.shape_cast %20 : vector<1x32x128xbf16> to vector<32x128xbf16>
    %cst_16 = arith.constant dense<0.000000e+00> : vector<128x128xf32>
    %22 = tpu.matmul %1, %21, %cst_16 {dimension_numbers = #tpu.dot_dimension_numbers<[1], [0], [0], [1], [0, 0, 1, 1], [], []>} : vector<128x32xbf16>, vector<32x128xbf16>, vector<128x128xf32> -> vector<128x128xf32>
    %c124_i32 = arith.constant 124 : i32
    %23 = tpu.dynamic_rotate %22 by %c124_i32 dim 0 : vector<128x128xf32>, i32 -> vector<128x128xf32>
    %24 = arith.addf %19, %23 : vector<128x128xf32>
    %25 = vector.shape_cast %24 : vector<128x128xf32> to vector<8x16x128xf32>
    %c0_17 = arith.constant 0 : index
    %c0_18 = arith.constant 0 : index
    %26 = vector.load %arg3[%c0_17, %c0_18] : memref<1x128xf32, #tpu.memory_space<vmem>>, vector<1x128xf32>
    %27 = vector.shape_cast %26 : vector<1x128xf32> to vector<1x1x128xf32>
    %28 = vector.broadcast %27 : vector<1x1x128xf32> to vector<8x16x128xf32>
    %29 = arith.addf %25, %28 : vector<8x16x128xf32>
    %cst_19 = arith.constant 0.000000e+00 : f32
    %30 = vector.broadcast %cst_19 : f32 to vector<8x16x128xf32>
    %31 = arith.maximumf %29, %30 : vector<8x16x128xf32>
    %c0_20 = arith.constant 0 : index
    %c0_21 = arith.constant 0 : index
    %32 = vector.load %arg4[%c0_20, %c0_21] : memref<16x128xf32, #tpu.memory_space<vmem>>, vector<16x128xf32>
    %33 = vector.shape_cast %32 : vector<16x128xf32> to vector<1x16x128xf32>
    %34 = vector.broadcast %33 : vector<1x16x128xf32> to vector<8x16x128xf32>
    %35 = arith.mulf %31, %34 : vector<8x16x128xf32>
    %cst_22 = arith.constant dense<0xFF800000> : vector<8x128xf32>
    %36 = vector.multi_reduction <maximumf>, %35, %cst_22 [1] : vector<8x16x128xf32> to vector<8x128xf32>
    %37 = arith.truncf %36 : vector<8x128xf32> to vector<8x128xbf16>
    %c0_23 = arith.constant 0 : index
    %c0_24 = arith.constant 0 : index
    %38 = vector.load %arg5[%c0_23, %c0_24] : memref<128x128xbf16, #tpu.memory_space<vmem>>, vector<128x128xbf16>
    %cst_25 = arith.constant dense<0.000000e+00> : vector<8x128xf32>
    %39 = tpu.matmul %37, %38, %cst_25 {dimension_numbers = #tpu.dot_dimension_numbers<[1], [0], [0], [1], [0, 0, 1, 1], [], []>} : vector<8x128xbf16>, vector<128x128xbf16>, vector<8x128xf32> -> vector<8x128xf32>
    %c0_26 = arith.constant 0 : index
    %c0_27 = arith.constant 0 : index
    %40 = vector.load %arg6[%c0_26, %c0_27] : memref<1x128xf32, #tpu.memory_space<vmem>>, vector<1x128xf32>
    %41 = vector.broadcast %40 : vector<1x128xf32> to vector<8x128xf32>
    %42 = arith.addf %39, %41 : vector<8x128xf32>
    %c0_28 = arith.constant 0 : index
    %c0_29 = arith.constant 0 : index
    %43 = vector.load %arg7[%c0_28, %c0_29] : memref<8x128xf32, #tpu.memory_space<vmem>>, vector<8x128xf32>
    tpu.vector_store %arg7[%c0_28, %c0_29], %42 {strides = array<i32>} : memref<8x128xf32, #tpu.memory_space<vmem>>, vector<8x128xf32>,
    return
  }
  func.func @transform_0(%arg0: i32) -> (i32, i32, i32) {
    %c0_i32 = arith.constant 0 : i32
    %c0_i32_0 = arith.constant 0 : i32
    %c0_i32_1 = arith.constant 0 : i32
    return %arg0, %c0_i32, %c0_i32_0 : i32, i32, i32
  }
  func.func @transform_1(%arg0: i32) -> (i32, i32, i32) {
    %c0_i32 = arith.constant 0 : i32
    %c0_i32_0 = arith.constant 0 : i32
    %c0_i32_1 = arith.constant 0 : i32
    %c0_i32_2 = arith.constant 0 : i32
    return %c0_i32, %c0_i32_0, %c0_i32_1 : i32, i32, i32
  }
  func.func @transform_2(%arg0: i32) -> (i32, i32) {
    %c0_i32 = arith.constant 0 : i32
    %c0_i32_0 = arith.constant 0 : i32
    %c0_i32_1 = arith.constant 0 : i32
    return %c0_i32, %c0_i32_0 : i32, i32
  }
  func.func @transform_3(%arg0: i32) -> (i32, i32) {
    %c0_i32 = arith.constant 0 : i32
    %c0_i32_0 = arith.constant 0 : i32
    %c0_i32_1 = arith.constant 0 : i32
    return %c0_i32, %c0_i32_0 : i32, i32
  }
  func.func @transform_4(%arg0: i32) -> (i32, i32) {
    %c0_i32 = arith.constant 0 : i32
    %c0_i32_0 = arith.constant 0 : i32
    %c0_i32_1 = arith.constant 0 : i32
    return %c0_i32, %c0_i32_0 : i32, i32
  }
  func.func @transform_5(%arg0: i32) -> (i32, i32) {
    %c0_i32 = arith.constant 0 : i32
    %c0_i32_0 = arith.constant 0 : i32
    %c0_i32_1 = arith.constant 0 : i32
    return %c0_i32, %c0_i32_0 : i32, i32
  }
  func.func @transform_6(%arg0: i32) -> (i32, i32) {
    %c0_i32 = arith.constant 0 : i32
    %c0_i32_0 = arith.constant 0 : i32
    return %arg0, %c0_i32 : i32, i32
  }
}

</mosaic_0001>

<bundles_post_ra>
// kernel: tpu_custom_call.1
= control target key start
LH: loop header
LB: loop body
LE: loop exit
PB: predicated region body
PF: predicated region fallthrough
CT: control target
= control target key end

     0   :  { %s2817_s0 = inlined_call_operand.hbm [shape: bf16[16,16,32], index: 0, kind: input, shape index: {}]   ;;  %s2818_s1 = inlined_call_operand.hbm [shape: bf16[5,32,128], index: 1, kind: input, shape index: {}]   ;;  %s2819_s2 = inlined_call_operand.vmem [shape: f32[1,128], index: 2, kind: input, shape index: {}]   ;;  %s2820_s3 = inlined_call_operand.hbm [shape: f32[16,128], index: 3, kind: input, shape index: {}]   ;;  %s2821_s4 = inlined_call_operand.hbm [shape: bf16[128,128], index: 4, kind: input, shape index: {}]   ;;  %s2822_s5 = inlined_call_operand.vmem [shape: f32[1,128], index: 5, kind: input, shape index: {}]   ;;  %s2823_s6 = inlined_call_operand.hbm [shape: f32[16,128], index: 6, kind: output, shape index: {}]  }
   0x1   :  { %2831 = sst [smem:[#allocation15_spill]] %s2818_s1 }
   0x2   :  { %11 = vsyncpa [#allocation3], 0 }
   0x3   :  { %13 = vsyncpa [#allocation3 + $0x1], 0 }
   0x4   :  { %14 = vsyncpa [#allocation6], 0 }
   0x5   :  { %15 = vsyncpa [#allocation9], 0 }
   0x6   :  { %16 = vsyncpa [#allocation4], 0 }
   0x7   :  { %18 = vsyncpa [#allocation4 + $0x1], 0  ;;  %s2145_s21 = smov 0   ;;  %s2147_s22 = smov 0  }
   0x8   :  { %s2149_s23 = smov 0   ;;  %s2151_s24 = smov 0  }
   0x9 LB: > { %s2166_s25 = sadd.s32 4294967295, %s2097_s24   ;;  %s1527_s26 = sadd.s32 4294967294, %s2097_s24   ;;  %s2097_s24 = sphi %s2151_s24, %s2854_s24   ;;  %s2093_s23 = sphi %s2149_s23, %s2853_s23   ;;  %s2089_s22 = sphi %s2147_s22, %s2852_s22   ;;  %s2085_s21 = sphi %s2145_s21, %s2851_s21  }
   0xa   : > { %p44_p0 = scmp.ne.s32.totalorder %s2089_s22, %s2085_s21  ;;  %p2824_p1 = scmp.eq.s32.totalorder %s2166_s25, 0 }
   0xb   : > { %p179_p3 = scmp.eq.s32.totalorder %s1527_s26, 1  ;;  %p1528_p5 = scmp.ge.s32.totalorder %s2097_s24, 1 }
   0xc   : > { %p2175_p4 = por %p2824_p1, %p44_p0  ;;  %p186_p7 = scmp.lt.s32.totalorder %s2097_s24, 3 }
   0xd   : > { %p2180_p6 = por %p179_p3, %p44_p0  ;;  %s2099_s30 = smov [#allocation5]  }
   0xe   : > { %s2832_s27 = scalar_select %p2175_p4, 1, 0 }
   0xf   : > { %s2833_s28 = scalar_select %p2180_p6, 1, 0 }
  0x10   : > { %p2185_p8 = pnand %p1528_p5, %p186_p7  ;;  %s198_s7 = sshll.u32 %s2099_s30, 4  ;;  %s2189_s7 = int_to_ptr.vmem [resolvable:$true] %s198_s7 }
  0x11   : > { %s2100_s9 = smov [#allocation7]   ;;  %s2836_s1 = sld [smem:[#allocation15_spill]] }
  0x12   : > { %s2834_s29 = scalar_select %p2185_p8, 1, 0 }
  0x13   : > { %p1816_p9 = pneg %p2185_p8  ;;  %s214_s10 = sshll.u32 %s2100_s9, 4  ;;  %s2200_s10 = int_to_ptr.vmem [resolvable:$true] %s214_s10 }
  0x15   : > { %p2196_p11 = pnand %p1816_p9, %p2824_p1 }
  0x17   : > { %s1909_s13 = scalar_lea.hbm %s2836_s1, 1280  ;;  %p2210_p13 = pneg %p2196_p11 }
  0x18   : > { %p1910_p12 = scmp.ne.s32.totalorder %s2836_s1, %s1909_s13  ;;  %p1916_p5 = scmp.lt.u32.totalorder %s1909_s13, %s2836_s1 }
  0x1a   : > { %p1912_p0 = pnand %p2210_p13, %p1910_p12 }
  0x1c   : > { %p1913_p3 = pneg %p1912_p0 }
  0x1e   : > { %p1918_p7 = pnand %p1916_p5, %p1913_p3 }
  0x20   : > { %1921 = shalt.err (!%p1918_p7)
}
  0x21   : > { %s1922_s19 = scalar_lea.vmem %s2189_s7, 1280  ;;  %p1930_p2 = scmp.lt.s32.totalorder %s2189_s7, %s2189_s7 }
  0x22   : > { %p1923_p9 = scmp.ne.s32.totalorder %s2189_s7, %s1922_s19  ;;  %p1931_p6 = scmp.lt.s32.totalorder %s1922_s19, %s1922_s19 }
  0x24   : > { %p1925_p10 = pnand %p1923_p9, %p2210_p13  ;;  %p1932_p12 = por %p1931_p6, %p1930_p2 }
  0x26   : > { %p1926_p1 = pneg %p1925_p10 }
  0x28   : > { %p1933_p0 = pnand %p1932_p12, %p1926_p1 }
  0x2a   : > { %1936 = shalt.err (!%p1933_p0)
}
  0x2b   : > { %s2825_s20 = smov 64   ;;  %s2827_s26 = smov 4  }
  0x2c   : > { %1819 = dma.hbm_to_vmem [thread:$0]  (!%p2196_p11), %s2836_s1, 1280, %s2189_s7, [#allocation6], %s2825_s20, %s2825_s20, %s2827_s26  }
  0x2d   : > { %s1937_s13 = scalar_lea.hbm %s2820_s3, 256 }
  0x2e   : > { %p1938_p1 = scmp.ne.s32.totalorder %s2820_s3, %s1937_s13  ;;  %p1944_p10 = scmp.lt.u32.totalorder %s1937_s13, %s2820_s3 }
  0x30   : > { %p1940_p2 = pnand %p1938_p1, %p2210_p13 }
  0x32   : > { %p1941_p6 = pneg %p1940_p2 }
  0x34   : > { %p1946_p3 = pnand %p1944_p10, %p1941_p6 }
  0x36   : > { %1949 = shalt.err (!%p1946_p3)
}
  0x37   : > { %s1950_s7 = scalar_lea.vmem %s2200_s10, 256  ;;  %p1958_p12 = scmp.lt.s32.totalorder %s2200_s10, %s2200_s10 }
  0x38   : > { %p1951_p5 = scmp.ne.s32.totalorder %s2200_s10, %s1950_s7  ;;  %p1959_p0 = scmp.lt.s32.totalorder %s1950_s7, %s1950_s7 }
  0x3a   : > { %p1953_p7 = pnand %p1951_p5, %p2210_p13  ;;  %p1960_p1 = por %p1959_p0, %p1958_p12 }
  0x3c   : > { %p1954_p9 = pneg %p1953_p7 }
  0x3e   : > { %p1961_p2 = pnand %p1960_p1, %p1954_p9 }
  0x40   : > { %1964 = shalt.err (!%p1961_p2)
}
  0x41   : > { %s2103_s19 = smov 128   ;;  %s2104_s30 = smov 8  }
  0x42   : > { %1822 = dma.hbm_to_vmem [thread:$0]  (!%p2196_p11), %s2820_s3, 256, %s2200_s10, [#allocation6], %s2103_s19, %s2103_s19, %s2104_s30  }
  0x43   : > { %s2105_s12 = smov [#allocation8]   ;;  %s2258_s14 = sadd.s32 1, %s2097_s24  }
  0x44   : > { %s227_s13 = sshll.u32 %s2105_s12, 4  ;;  %s1965_s18 = scalar_lea.hbm %s2821_s4, 1024  ;;  %s228_s13 = int_to_ptr.vmem [resolvable:$true] %s227_s13 }
  0x45   : > { %p1966_p6 = scmp.ne.s32.totalorder %s2821_s4, %s1965_s18  ;;  %p1972_p5 = scmp.lt.u32.totalorder %s1965_s18, %s2821_s4 }
  0x47   : > { %p1968_p10 = pnand %p1966_p6, %p2210_p13 }
  0x49   : > { %p1969_p3 = pneg %p1968_p10 }
  0x4b   : > { %p1974_p7 = pnand %p1972_p5, %p1969_p3 }
  0x4d   : > { %1977 = shalt.err (!%p1974_p7)
}
  0x4e   : > { %s1978_s10 = scalar_lea.vmem %s228_s13, 1024  ;;  %p1986_p1 = scmp.lt.s32.totalorder %s228_s13, %s228_s13 }
  0x4f   : > { %p1979_p9 = scmp.ne.s32.totalorder %s228_s13, %s1978_s10  ;;  %p1987_p2 = scmp.lt.s32.totalorder %s1978_s10, %s1978_s10 }
  0x51   : > { %p1981_p12 = pnand %p1979_p9, %p2210_p13  ;;  %p1988_p4 = por %p1987_p2, %p1986_p1 }
  0x53   : > { %p1982_p0 = pneg %p1981_p12 }
  0x55   : > { %p1989_p8 = pnand %p1988_p4, %p1982_p0 }
  0x57   : > { %1992 = shalt.err (!%p1989_p8)
}
  0x58   : > { %s2838_s20 = smov 4   ;;  %s2839_s19 = smov 64  }
  0x59   : > { %1825 = dma.hbm_to_vmem [thread:$0]  (!%p2196_p11), %s2821_s4, 1024, %s228_s13, [#allocation9], %s2839_s19, %s2839_s19, %s2838_s20  }
  0x5a   : > { %s28_s16 = ssub.s32 %s2097_s24, %s2258_s14  ;;  %s31_s8 = sadd.s32 1, %s2093_s23 }
  0x5b   : > { %p29_p4 = scmp.eq.s32.totalorder %s28_s16, 0  ;;  %p38_p8 = scmp.ne.s32.totalorder %s2093_s23, %s2089_s22 }
  0x5c   : > { %p39_p13 = scmp.eq.s32.totalorder %s2097_s24, 0  ;;  %p1837_p6 = scmp.lt.s32.totalorder %s2097_s24, 2 }
  0x5d   : > { %s2289_s30 = scalar_select %p29_p4, %s2093_s23, %s31_s8  }
  0x5e   : > { %p40_p10 = por %p39_p13, %p38_p8  ;;  %p2840_p3 = scmp.eq.s32.totalorder %s2166_s25, 1 }
  0x5f   : > { %s244_s11 = sand.u32 1, %s2093_s23   ;;  %s1616_s12 = sshll.u32 %s2097_s24, 10 }
  0x60   : > { %p2293_p5 = por %p2840_p3, %p38_p8  ;;  %s1533_s15 = sshll.u32 %s244_s11, 6 }
  0x61   : > { %s2302_s13 = scalar_lea.hbm %s2817_s0, %s1616_s12  ;;  %s248_s7 = scalar_lea.vmem [#allocation2], %s1533_s15 }
  0x62   : > { %s256_s10 = sshll.u32 %s248_s7, 4  ;;  %p2304_p11 = pnand %p1837_p6, %p40_p10  ;;  %s2308_s10 = int_to_ptr.vmem [resolvable:$true] %s256_s10 }
  0x63   : > { %s2310_s26 = scalar_lea.sflag [#allocation3], %s244_s11  ;;  %s1993_s16 = scalar_lea.hbm %s2302_s13, 1024 }
  0x64   : > { %p1994_p7 = scmp.ne.s32.totalorder %s2302_s13, %s1993_s16  ;;  %p1995_p9 = pneg %p2304_p11 }
  0x65   : > { %s1998_s15 = scalar_lea.hbm %s2817_s0, 2048  ;;  %p1999_p1 = scmp.lt.u32.totalorder %s2302_s13, %s2817_s0 }
  0x66   : > { %p1996_p12 = pnand %p1995_p9, %p1994_p7  ;;  %p2000_p2 = scmp.lt.u32.totalorder %s1998_s15, %s1993_s16 }
  0x67   : > { %p2002_p8 = scmp.lt.u32.totalorder %s1993_s16, %s2302_s13 }
  0x68   : > { %p1997_p0 = pneg %p1996_p12  ;;  %p2001_p4 = por %p2000_p2, %p1999_p1 }
  0x6a   : > { %p2003_p13 = por %p2002_p8, %p2001_p4 }
  0x6c   : > { %p2004_p6 = pnand %p2003_p13, %p1997_p0 }
  0x6e   : > { %2007 = shalt.err (!%p2004_p6)
}
  0x6f   : > { %s2008_s11 = scalar_lea.vmem %s2308_s10, 1024  ;;  %s2106_s7 = smov [#allocation2]  }
  0x70   : > { %p2009_p10 = scmp.ne.s32.totalorder %s2308_s10, %s2008_s11  ;;  %s2013_s8 = sshll.u32 %s2106_s7, 4  ;;  %s2014_s8 = int_to_ptr.vmem [resolvable:$false] %s2013_s8 }
  0x71   : > { %s2015_s12 = scalar_lea.vmem %s2014_s8, 2048  ;;  %p2016_p12 = scmp.lt.s32.totalorder %s2308_s10, %s2014_s8 }
  0x72   : > { %p2011_p3 = pnand %p2009_p10, %p1995_p9  ;;  %p2017_p1 = scmp.lt.s32.totalorder %s2015_s12, %s2008_s11 }
  0x74   : > { %p2012_p7 = pneg %p2011_p3  ;;  %p2018_p2 = por %p2017_p1, %p2016_p12 }
  0x76   : > { %p2019_p4 = pnand %p2018_p2, %p2012_p7 }
  0x78   : > { %2022 = shalt.err (!%p2019_p4)
}
  0x79   : > { %1829 = dma.hbm_to_vmem [thread:$0]  (!%p2304_p11), %s2302_s13, 1024, %s2308_s10, %s2310_s26, %s2839_s19, %s2839_s19, %s2838_s20  }
  0x7a   : > { %p2843_p9 = scmp.ne.s32.totalorder %s2834_s29, 0 }
  0x7b   : > { %s2344_s16 = sand.u32 (!%p2843_p9), 1, %s2089_s22   ;;  %p2844_p0 = scmp.ne.s32.totalorder (!%p2843_p9), %s2832_s27, 0 }
  0x7c   : > { %268 = sbr.rel (%p2843_p9) target bundleno = 715 (0x2cb), region = 44  ;;  %s1538_s15 = sshll.u32 (!%p2843_p9), %s2344_s16, 6 }
  0x7d   : > { %s271_s17 = scalar_lea.sflag (!%p2843_p9), [#allocation3], %s2344_s16  ;;  %s2348_s18 = scalar_lea.vmem (!%p2843_p9), [#allocation2], %s1538_s15 }
  0x83   : > { %2068 = dma.done.wait (%p2844_p0), %s271_s17, 1024  }
  0x84   : > { %2070 = vsyncadd (%p2844_p0), %s271_s17, 4294966272  ;;  %p2845_p11 = scmp.eq.s32.totalorder %s2166_s25, 0 }
  0x86   : > { %2072 = dma.done.wait (%p2845_p11), [#allocation6], 1536   ;;  %p2846_p8 = pmov %p2845_p11 }
  0x88   : > { %2074 = vsyncadd (%p2846_p8), [#allocation6], 4294965760  ;;  %p2847_p13 = pmov %p2846_p8 }
  0x89   : > { %p2848_p6 = pmov %p2846_p8 }
  0x8a   : > { %2076 = dma.done.wait (%p2847_p13), [#allocation9], 1024  }
  0x8b   : > { %2078 = vsyncadd (%p2848_p6), [#allocation9], 4294966272  ;;  %v1883_v0 = vld [vmem:[#allocation5 + $0x10] sm:$0xff]   ;;  %v1884_v1 = vld [vmem:[#allocation5 + $0x18] sm:$0xff]   ;;  %vm394_vm0 = vcmask 261120   ;;  %v2107_v19 = vmov 0.0   ;;  %v532_v26 = vlaneseq }
  0x8c   : > { %1676 = vmatprep.subr.bf16.mxu0 %v1883_v0  ;;  %1796 = vmatprep.subr.bf16.mxu1 %v1883_v0  ;;  %v2363_v2 = vld [vmem:[%s2348_s18] sm:$0xff]   ;;  %v2366_v3 = vld [vmem:[%s2348_s18 + $0x30] sm:$0xff]   ;;  %v2369_v4 = vld [vmem:[%s2348_s18 + $0x8] sm:$0xff]   ;;  %vm2108_vm1 = vmmov 0   ;;  %vm1309_vm6 = vcmask 1041409   ;;  %vm1311_vm7 = vcmask 1042434  }
  0x8d   : > { %1677 = vmatpush3.bf16.msra.mxu0 %v1883_v0  ;;  %1798 = vmatpush3.bf16.msra.mxu1 %v1883_v0  ;;  %v2376_v5 = vld [vmem:[%s2348_s18 + $0x38] sm:$0xff]   ;;  %v1889_v6 = vld [vmem:[#allocation5] sm:$0xff]   ;;  %v1891_v8 = vld [vmem:[#allocation5 + $0x8] sm:$0xff]   ;;  %v2438_v28 = vshrl.u32 %v532_v26, 7  ;;  %vm1313_vm8 = vcmask 1043459   ;;  %vm1315_vm9 = vcmask 1044484  }
  0x8e   : > { %1678 = vmatprep.subr.bf16.mxu0 %v1884_v1  ;;  %1797 = vmatprep.subr.bf16.mxu1 %v1884_v1  ;;  %v1890_v7 = vld [vmem:[#allocation5 + $0x20] sm:$0xff]   ;;  %v1892_v9 = vld [vmem:[%s2348_s18 + $0x10] sm:$0xff]   ;;  %v1894_v10 = vld [vmem:[#allocation5 + $0x28] sm:$0xff]   ;;  %vm1317_vm10 = vcmask 1045509   ;;  %vm1319_vm11 = vcmask 1046534   ;;  %vm1321_vm12 = vcmask 1047559  }
  0x8f   : > { %1680 = vmatprep.mubr.msk.bf16.mxu0 %vm394_vm0, %v2363_v2  ;;  %1692 = vmatprep.mubr.msk.bf16.mxu1 %vm394_vm0, %v2366_v3  ;;  %v1893_v11 = vld [vmem:[%s2348_s18 + $0x18] sm:$0xff]   ;;  %v1895_v12 = vld [vmem:[%s2348_s18 + $0x20] sm:$0xff]   ;;  %v1897_v13 = vld [vmem:[#allocation5 + $0x30] sm:$0xff]   ;;  %vm534_vm2 = vcmp.lt.s32.totalorder %v2438_v28, 7  ;;  %vm790_vm3 = vcmp.lt.s32.totalorder %v2438_v28, 6  ;;  %vm953_vm4 = vcmp.lt.s32.totalorder %v2438_v28, 5 }
  0x90   : > { %v1898_v14 = vld [vmem:[#allocation5 + $0x40] sm:$0xff]   ;;  %v1899_v15 = vld [vmem:[#allocation5 + $0x38] sm:$0xff]   ;;  %v1896_v16 = vld [vmem:[%s2348_s18 + $0x28] sm:$0xff]   ;;  %vm1116_vm5 = vcmp.lt.s32.totalorder %v2438_v28, 4  ;;  %s1542_s20 = sshll.u32 %s2344_s16, 3  ;;  %s1612_s10 = sshll.u32 %s2166_s25, 7 }
  0x91   : > { %1679 = vmatpush3.bf16.msra.mxu0 %v1884_v1  ;;  %1799 = vmatpush3.bf16.msra.mxu1 %v1884_v1  ;;  %v1900_v17 = vld [vmem:[#allocation5 + $0x48] sm:$0xff]   ;;  %v1901_v18 = vld [vmem:[#allocation8] sm:$0xff]   ;;  %v1903_v21 = vld [vmem:[#allocation8 + $0x10] sm:$0xff]   ;;  %s314_s1 = scalar_lea.vmem [#allocation10], %s1542_s20  ;;  %s2773_s8 = scalar_lea.hbm %s2823_s6, %s1612_s10 }
  0x92   : > { %1696 = vmatprep.subr.bf16.mxu1 %v1889_v6  ;;  %1716 = vmatprep.subr.bf16.mxu0 %v1890_v7  ;;  %v1902_v20 = vld [vmem:[#allocation8 + $0x8] sm:$0xff]   ;;  %v1904_v22 = vld [vmem:[#allocation8 + $0x18] sm:$0xff]   ;;  %v1905_v23 = vld [vmem:[#allocation8 + $0x20] sm:$0xff]   ;;  %s1428_s26 = sshll.u32 %s314_s1, 4  ;;  %s1415_s12 = scalar_lea.sflag [#allocation4], %s2344_s16  ;;  %s2775_s26 = int_to_ptr.vmem [resolvable:$true] %s1428_s26 }
  0x93   : > { %v1906_v24 = vld [vmem:[#allocation8 + $0x28] sm:$0xff]   ;;  %v1907_v25 = vld [vmem:[#allocation8 + $0x30] sm:$0xff]   ;;  %v1908_v27 = vld [vmem:[#allocation8 + $0x38] sm:$0xff]   ;;  %s2023_s25 = scalar_lea.vmem %s2775_s26, 128  ;;  %s2109_s15 = smov [#allocation10]  }
  0x94   : > { %1681 = vmatmul.mubr.msk.bf16.vlgmr.msra.gmra.mrb[0].mxu0 %vm394_vm0, %v2369_v4  ;;  %1693 = vmatmul.mubr.msk.bf16.vlgmr.msra.gmra.mrb[0].mxu1 %vm394_vm0, %v2376_v5  ;;  %p2024_p10 = scmp.ne.s32.totalorder %s2775_s26, %s2023_s25  ;;  %s2027_s17 = sshll.u32 %s2109_s15, 4  ;;  %s2028_s17 = int_to_ptr.vmem [resolvable:$false] %s2027_s17 }
  0x95   : > { %1697 = vmatpush3.bf16.msra.mxu1 %v1889_v6  ;;  %1717 = vmatpush3.bf16.msra.mxu0 %v1890_v7  ;;  %s2029_s18 = scalar_lea.vmem %s2028_s17, 256  ;;  %p2030_p12 = scmp.lt.s32.totalorder %s2775_s26, %s2028_s17 }
  0x96   : > { %1698 = vmatprep.subr.bf16.mxu1 %v1891_v8  ;;  %1684 = vmatprep.mubr.msk.bf16.mxu0 %vm394_vm0, %v1892_v9  ;;  %p2025_p3 = pnand %p2024_p10, %p2293_p5  ;;  %p2031_p1 = scmp.lt.s32.totalorder %s2029_s18, %s2023_s25 }
  0x97   : > { %1700 = vmatprep.mubr.msk.bf16.mxu1 %vm394_vm0, %v2363_v2  ;;  %1718 = vmatprep.subr.bf16.mxu0 %v1894_v10 }
  0x98   : > { %p2026_p7 = pneg %p2025_p3  ;;  %p2032_p2 = por %p2031_p1, %p2030_p12 }
  0x99   : > { %1699 = vmatpush3.bf16.msra.mxu1 %v1891_v8  ;;  %1719 = vmatpush3.bf16.msra.mxu0 %v1894_v10 }
  0x9a   : > { %1736 = vmatprep.subr.bf16.mxu1 %v1897_v13  ;;  %1756 = vmatprep.subr.bf16.mxu0 %v1898_v14  ;;  %p2033_p4 = pnand %p2032_p2, %p2026_p7 }
  0x9c   : > { %1685 = vmatmul.mubr.msk.bf16.gmra.mrb[4].mxu0 %vm394_vm0, %v1893_v11  ;;  %1701 = vmatmul.mubr.msk.bf16.vlgmr.msra.gmra.mrb[4].mxu1 %vm394_vm0, %v2369_v4 }
  0x9d   : > { %1688 = vmatprep.mubr.msk.bf16.mxu0 %vm394_vm0, %v1895_v12  ;;  %1704 = vmatprep.mubr.msk.bf16.mxu1 %vm394_vm0, %v1892_v9 }
  0x9e   : > { %1737 = vmatpush3.bf16.msra.mxu1 %v1897_v13 }
  0x9f   : > { %1738 = vmatprep.subr.bf16.mxu1 %v1899_v15 }
  0xa2   : > { %1739 = vmatpush3.bf16.msra.mxu1 %v1899_v15 }
  0xa3   : > { %1776 = vmatprep.subr.bf16.mxu1 %v2107_v19 }
  0xa4   : > { %1689 = vmatmul.mubr.msk.bf16.gmra.mrb[8].mxu0 %vm394_vm0, %v1896_v16  ;;  %1705 = vmatmul.mubr.msk.bf16.gmra.mrb[8].mxu1 %vm394_vm0, %v1893_v11 }
  0xa5   : > { %1708 = vmatprep.mubr.msk.bf16.mxu1 %vm394_vm0, %v1895_v12  ;;  %1720 = vmatprep.mubr.msk.bf16.mxu0 %vm394_vm0, %v2363_v2 }
  0xac   : > { %1709 = vmatmul.mubr.msk.bf16.gmra.mrb[12].mxu1 %vm394_vm0, %v1896_v16  ;;  %1721 = vmatmul.mubr.msk.bf16.vlgmr.msra.gmra.mrb[12].mxu0 %vm394_vm0, %v2369_v4 }
  0xad   : > { %1757 = vmatpush3.bf16.msra.mxu0 %v1898_v14  ;;  %1712 = vmatprep.mubr.msk.bf16.mxu1 %vm394_vm0, %v2366_v3 }
  0xae   : > { %1724 = vmatprep.mubr.msk.bf16.mxu0 %vm394_vm0, %v1892_v9  ;;  %1758 = vmatprep.subr.bf16.mxu0 %v1900_v17 }
  0xb1   : > { %1759 = vmatpush3.bf16.msra.mxu0 %v1900_v17 }
  0xb4   : > { %1713 = vmatmul.mubr.msk.bf16.gmra.mrb[16].mxu1 %vm394_vm0, %v2376_v5  ;;  %1725 = vmatmul.mubr.msk.bf16.gmra.mrb[16].mxu0 %vm394_vm0, %v1893_v11 }
  0xb5   : > { %1728 = vmatprep.mubr.msk.bf16.mxu0 %vm394_vm0, %v1895_v12  ;;  %1740 = vmatprep.mubr.msk.bf16.mxu1 %vm394_vm0, %v2363_v2 }
  0xbc   : > { %1729 = vmatmul.mubr.msk.bf16.gmra.mrb[20].mxu0 %vm394_vm0, %v1896_v16  ;;  %1741 = vmatmul.mubr.msk.bf16.vlgmr.msra.gmra.mrb[20].mxu1 %vm394_vm0, %v2369_v4 }
  0xbd   : > { %1732 = vmatprep.mubr.msk.bf16.mxu0 %vm394_vm0, %v2366_v3  ;;  %1744 = vmatprep.mubr.msk.bf16.mxu1 %vm394_vm0, %v1892_v9 }
  0xbe   : > { %1777 = vmatpush3.bf16.msra.mxu1 %v1901_v18 }
  0xbf   : > { %1778 = vmatprep.subr.bf16.mxu1 %v2107_v19 }
  0xc2   : > { %1779 = vmatpush3.bf16.msra.mxu1 %v1902_v20 }
  0xc3   : > { %1780 = vmatprep.subr.bf16.mxu1 %v2107_v19 }
  0xc4   : > { %1733 = vmatmul.mubr.msk.bf16.gmra.mrb[24].mxu0 %vm394_vm0, %v2376_v5  ;;  %1745 = vmatmul.mubr.msk.bf16.gmra.mrb[24].mxu1 %vm394_vm0, %v1893_v11 }
  0xc5   : > { %1748 = vmatprep.mubr.msk.bf16.mxu1 %vm394_vm0, %v1895_v12  ;;  %1760 = vmatprep.mubr.msk.bf16.mxu0 %vm394_vm0, %v2363_v2 }
  0xc6   : > { %1781 = vmatpush3.bf16.msra.mxu1 %v1903_v21 }
  0xc7   : > { %1782 = vmatprep.subr.bf16.mxu1 %v2107_v19 }
  0xca   : > { %1783 = vmatpush3.bf16.msra.mxu1 %v1904_v22 }
  0xcb   : > { %1784 = vmatprep.subr.bf16.mxu1 %v2107_v19 }
  0xcc   : > { %1749 = vmatmul.mubr.msk.bf16.gmra.mrb[28].mxu1 %vm394_vm0, %v1896_v16  ;;  %1761 = vmatmul.mubr.msk.bf16.vlgmr.msra.gmra.mrb[28].mxu0 %vm394_vm0, %v2369_v4 }
  0xcd   : > { %1752 = vmatprep.mubr.msk.bf16.mxu1 %vm394_vm0, %v2366_v3  ;;  %1764 = vmatprep.mubr.msk.bf16.mxu0 %vm394_vm0, %v1892_v9 }
  0xce   : > { %1785 = vmatpush3.bf16.msra.mxu1 %v1905_v23 }
  0xcf   : > { %1786 = vmatprep.subr.bf16.mxu1 %v2107_v19 }
  0xd2   : > { %1787 = vmatpush3.bf16.msra.mxu1 %v1906_v24 }
  0xd3   : > { %1788 = vmatprep.subr.bf16.mxu1 %v2107_v19 }
  0xd4   : > { %1753 = vmatmul.mubr.msk.bf16.gmra.mrb[32].mxu1 %vm394_vm0, %v2376_v5  ;;  %1765 = vmatmul.mubr.msk.bf16.gmra.mrb[32].mxu0 %vm394_vm0, %v1893_v11 }
  0xd5   : > { %1768 = vmatprep.mubr.msk.bf16.mxu0 %vm394_vm0, %v1895_v12  ;;  %1792 = vmatprep.mubr.msk.bf16.mxu1 %vm2108_vm1, %v2107_v19 }
  0xd6   : > { %1789 = vmatpush3.bf16.msra.mxu1 %v1907_v25 }
  0xd7   : > { %1790 = vmatprep.subr.bf16.mxu1 %v2107_v19 }
  0xda   : > { %1791 = vmatpush3.bf16.msra.mxu1 %v1908_v27 }
  0xdc   : > { %1769 = vmatmul.mubr.msk.bf16.gmra.mrb[36].mxu0 %vm394_vm0, %v1896_v16 }
  0xdd   : > { %1772 = vmatprep.mubr.msk.bf16.mxu0 %vm394_vm0, %v2366_v3 }
  0xe4   : > { %1773 = vmatmul.mubr.msk.bf16.gmra.mrb[40].mxu0 %vm394_vm0, %v2376_v5 }
 0x167   : > { %v1682_v29 = vpop.f32.mrb[0].mxu0  ;;  %v1694_v30 = vpop.f32.mrb[0].mxu1 }
 0x168   : > { %v530_v31 = vrot.slane %v1694_v30, 1  ;;  %v453_v32 = vpop.f32.mrb[1].mxu0  ;;  %v501_v33 = vpop.f32.mrb[1].mxu1  ;;  %v518_v38 = vrot.slane %v1682_v29, 1 }
 0x169   : > { %v516_v34 = vrot.slane %v453_v32, 1  ;;  %v528_v35 = vrot.slane %v501_v33, 1  ;;  %v1683_v36 = vpop.f32.mrb[2].mxu0  ;;  %v1695_v37 = vpop.f32.mrb[2].mxu1 }
 0x16a   : > { %v519_v39 = vrot.slane %v1683_v36, 1  ;;  %v531_v40 = vrot.slane %v1695_v37, 1  ;;  %v456_v41 = vpop.f32.mrb[3].mxu0  ;;  %v504_v42 = vpop.f32.mrb[3].mxu1 }
 0x16b   : > { %v517_v43 = vrot.slane %v456_v41, 1  ;;  %v529_v44 = vrot.slane %v504_v42, 1 }
 0x16c   : > { %v547_v45 = vsel %vm534_vm2, %v518_v38, %v519_v39  ;;  %v2445_v46 = vsel %vm534_vm2, %v530_v31, %v531_v40  ;;  %v2449_v47 = vsel %vm534_vm2, %v531_v40, %v516_v34 }
 0x16d   : > { %v549_v48 = vsel %vm534_vm2, %v516_v34, %v517_v43  ;;  %v548_v49 = vsel %vm534_vm2, %v517_v43, %v518_v38  ;;  %v2457_v50 = vsel %vm534_vm2, %v528_v35, %v529_v44  ;;  %v2461_v51 = vsel %vm534_vm2, %v529_v44, %v530_v31 }
 0x16f   : > { %v1686_v52 = vpop.f32.mrb[4].mxu0  ;;  %v1702_v53 = vpop.f32.mrb[4].mxu1 }
 0x170   : > { %v606_v54 = vadd.f32 %v1702_v53, %v547_v45  ;;  %v469_v55 = vpop.f32.mrb[5].mxu0  ;;  %v597_v56 = vpop.f32.mrb[5].mxu1  ;;  %v522_v61 = vrot.slane %v1686_v52, 1 }
 0x171   : > { %v520_v57 = vrot.slane %v469_v55, 1  ;;  %v598_v58 = vadd.f32 %v597_v56, %v549_v48  ;;  %v1687_v59 = vpop.f32.mrb[6].mxu0  ;;  %v1703_v60 = vpop.f32.mrb[6].mxu1 }
 0x172   : > { %v523_v62 = vrot.slane %v1687_v59, 1  ;;  %v472_v63 = vpop.f32.mrb[7].mxu0  ;;  %v600_v0 = vpop.f32.mrb[7].mxu1 }
 0x173   : > { %v546_v1 = vsel %vm534_vm2, %v519_v39, %v520_v57  ;;  %v521_v2 = vrot.slane %v472_v63, 1  ;;  %v601_v3 = vadd.f32 %v600_v0, %v548_v49 }
 0x174   : > { %v2465_v4 = vadd.f32 %v1703_v60, %v546_v1  ;;  %v543_v5 = vsel %vm534_vm2, %v522_v61, %v523_v62 }
 0x175   : > { %v545_v6 = vsel %vm534_vm2, %v520_v57, %v521_v2  ;;  %v544_v7 = vsel %vm534_vm2, %v521_v2, %v522_v61 }
 0x177   : > { %v1690_v8 = vpop.f32.mrb[8].mxu0  ;;  %v1706_v9 = vpop.f32.mrb[8].mxu1 }
 0x178   : > { %v622_v10 = vadd.f32 %v1706_v9, %v543_v5  ;;  %v485_v11 = vpop.f32.mrb[9].mxu0  ;;  %v613_v12 = vpop.f32.mrb[9].mxu1  ;;  %v526_v17 = vrot.slane %v1690_v8, 1 }
 0x179   : > { %v524_v13 = vrot.slane %v485_v11, 1  ;;  %v614_v14 = vadd.f32 %v613_v12, %v545_v6  ;;  %v1691_v15 = vpop.f32.mrb[10].mxu0  ;;  %v1707_v16 = vpop.f32.mrb[10].mxu1 }
 0x17a   : > { %v527_v18 = vrot.slane %v1691_v15, 1  ;;  %v488_v19 = vpop.f32.mrb[11].mxu0  ;;  %v616_v20 = vpop.f32.mrb[11].mxu1 }
 0x17b   : > { %v542_v21 = vsel %vm534_vm2, %v523_v62, %v524_v13  ;;  %v525_v22 = vrot.slane %v488_v19, 1  ;;  %v617_v23 = vadd.f32 %v616_v20, %v544_v7 }
 0x17c   : > { %v2475_v24 = vadd.f32 %v1707_v16, %v542_v21  ;;  %v539_v25 = vsel %vm534_vm2, %v526_v17, %v527_v18  ;;  %v538_v26 = vsel %vm534_vm2, %v527_v18, %v528_v35 }
 0x17d   : > { %v541_v27 = vsel %vm534_vm2, %v524_v13, %v525_v22  ;;  %v540_v29 = vsel %vm534_vm2, %v525_v22, %v526_v17 }
 0x17f   : > { %v1710_v30 = vpop.f32.mrb[12].mxu1  ;;  %v1722_v31 = vpop.f32.mrb[12].mxu0 }
 0x180   : > { %v2485_v32 = vadd.f32 %v1710_v30, %v539_v25  ;;  %v629_v33 = vpop.f32.mrb[13].mxu1  ;;  %v2487_v34 = vpop.f32.mrb[13].mxu0  ;;  %v776_v35 = vrot.slane %v1722_v31, 2 }
 0x181   : > { %v2489_v36 = vadd.f32 %v629_v33, %v541_v27  ;;  %v1711_v37 = vpop.f32.mrb[14].mxu1  ;;  %v1723_v38 = vpop.f32.mrb[14].mxu0  ;;  %v774_v43 = vrot.slane %v2487_v34, 2 }
 0x182   : > { %v2492_v39 = vadd.f32 %v1711_v37, %v538_v26  ;;  %v777_v40 = vrot.slane %v1723_v38, 2  ;;  %v632_v41 = vpop.f32.mrb[15].mxu1  ;;  %v714_v42 = vpop.f32.mrb[15].mxu0 }
 0x183   : > { %v633_v44 = vadd.f32 %v632_v41, %v540_v29  ;;  %v775_v45 = vrot.slane %v714_v42, 2 }
 0x184   : > { %v803_v48 = vsel %vm790_vm3, %v776_v35, %v777_v40 }
 0x185   : > { %v809_v49 = vadd.f32 %v803_v48, %v606_v54  ;;  %v804_v52 = vsel %vm790_vm3, %v775_v45, %v776_v35  ;;  %v805_v53 = vsel %vm790_vm3, %v774_v43, %v775_v45 }
 0x186   : > { %v807_v55 = vadd.f32 %v805_v53, %v598_v58  ;;  %v808_v56 = vadd.f32 %v804_v52, %v601_v3 }
 0x187   : > { %v1714_v57 = vpop.f32.mrb[16].mxu1  ;;  %v1726_v59 = vpop.f32.mrb[16].mxu0 }
 0x188   : > { %v2504_v60 = vadd.f32 %v1714_v57, %v2445_v46  ;;  %v645_v61 = vpop.f32.mrb[17].mxu1  ;;  %v727_v62 = vpop.f32.mrb[17].mxu0  ;;  %v780_v2 = vrot.slane %v1726_v59, 2 }
 0x189   : > { %v2507_v63 = vadd.f32 %v645_v61, %v2457_v50  ;;  %v778_v54 = vrot.slane %v727_v62, 2  ;;  %v1715_v0 = vpop.f32.mrb[18].mxu1  ;;  %v1727_v1 = vpop.f32.mrb[18].mxu0 }
 0x18a   : > { %v2510_v5 = vadd.f32 %v1715_v0, %v2449_v47  ;;  %v781_v6 = vrot.slane %v1727_v1, 2  ;;  %v648_v58 = vpop.f32.mrb[19].mxu1  ;;  %v730_v3 = vpop.f32.mrb[19].mxu0 }
 0x18b   : > { %v802_v7 = vsel %vm790_vm3, %v777_v40, %v778_v54  ;;  %v2515_v46 = vadd.f32 %v648_v58, %v2461_v51  ;;  %v779_v8 = vrot.slane %v730_v3, 2 }
 0x18c   : > { %v810_v50 = vadd.f32 %v802_v7, %v2465_v4  ;;  %v799_v9 = vsel %vm790_vm3, %v780_v2, %v781_v6 }
 0x18d   : > { %v2520_v11 = vadd.f32 %v799_v9, %v622_v10  ;;  %v800_v47 = vsel %vm790_vm3, %v779_v8, %v780_v2  ;;  %v801_v12 = vsel %vm790_vm3, %v778_v54, %v779_v8 }
 0x18e   : > { %v2526_v13 = vadd.f32 %v801_v12, %v614_v14  ;;  %v2528_v15 = vadd.f32 %v800_v47, %v617_v23 }
 0x18f   : > { %v1730_v51 = vpop.f32.mrb[20].mxu0  ;;  %v1742_v16 = vpop.f32.mrb[20].mxu1 }
 0x190   : > { %v939_v17 = vrot.slane %v1742_v16, 3  ;;  %v743_v18 = vpop.f32.mrb[21].mxu0  ;;  %v2530_v4 = vpop.f32.mrb[21].mxu1  ;;  %v784_v21 = vrot.slane %v1730_v51, 2 }
 0x191   : > { %v782_v19 = vrot.slane %v743_v18, 2  ;;  %v1731_v20 = vpop.f32.mrb[22].mxu0  ;;  %v1743_v10 = vpop.f32.mrb[22].mxu1  ;;  %v937_v22 = vrot.slane %v2530_v4, 3 }
 0x192   : > { %v785_v25 = vrot.slane %v1731_v20, 2  ;;  %v940_v26 = vrot.slane %v1743_v10, 3  ;;  %v746_v14 = vpop.f32.mrb[23].mxu0  ;;  %v877_v27 = vpop.f32.mrb[23].mxu1 }
 0x193   : > { %v798_v23 = vsel %vm790_vm3, %v781_v6, %v782_v19  ;;  %v783_v29 = vrot.slane %v746_v14, 2  ;;  %v938_v30 = vrot.slane %v877_v27, 3 }
 0x194   : > { %v2537_v31 = vadd.f32 %v798_v23, %v2475_v24  ;;  %v795_v33 = vsel %vm790_vm3, %v784_v21, %v785_v25  ;;  %v966_v37 = vsel %vm953_vm4, %v939_v17, %v940_v26 }
 0x195   : > { %v2544_v38 = vadd.f32 %v795_v33, %v2485_v32  ;;  %v2546_v35 = vadd.f32 %v966_v37, %v809_v49  ;;  %v796_v40 = vsel %vm790_vm3, %v783_v29, %v784_v21  ;;  %v797_v41 = vsel %vm790_vm3, %v782_v19, %v783_v29 }
 0x196   : > { %v2553_v24 = vadd.f32 %v797_v41, %v2489_v36  ;;  %v2555_v42 = vadd.f32 %v796_v40, %v633_v44  ;;  %v967_v45 = vsel %vm953_vm4, %v938_v30, %v939_v17  ;;  %v968_v32 = vsel %vm953_vm4, %v937_v22, %v938_v30 }
 0x197   : > { %v2563_v48 = vadd.f32 %v968_v32, %v807_v55  ;;  %v2565_v49 = vadd.f32 %v967_v45, %v808_v56  ;;  %v1734_v52 = vpop.f32.mrb[24].mxu0  ;;  %v1746_v53 = vpop.f32.mrb[24].mxu1 }
 0x198   : > { %v759_v57 = vpop.f32.mrb[25].mxu0  ;;  %v890_v59 = vpop.f32.mrb[25].mxu1  ;;  %v943_v36 = vrot.slane %v1746_v53, 3  ;;  %v788_v0 = vrot.slane %v1734_v52, 2  ;;  %v2629_v52 = vld [vmem:[%s2819_s2] ss:$0 sm:$0xff] }
 0x199   : > { %v786_v61 = vrot.slane %v759_v57, 2  ;;  %v941_v44 = vrot.slane %v890_v59, 3  ;;  %v1735_v62 = vpop.f32.mrb[26].mxu0  ;;  %v1747_v54 = vpop.f32.mrb[26].mxu1 }
 0x19a   : > { %v789_v1 = vrot.slane %v1735_v62, 2  ;;  %v944_v2 = vrot.slane %v1747_v54, 3  ;;  %v762_v6 = vpop.f32.mrb[27].mxu0  ;;  %v893_v58 = vpop.f32.mrb[27].mxu1 }
 0x19b   : > { %v794_v55 = vsel %vm790_vm3, %v785_v25, %v786_v61  ;;  %v965_v56 = vsel %vm953_vm4, %v940_v26, %v941_v44  ;;  %v787_v3 = vrot.slane %v762_v6, 2  ;;  %v942_v7 = vrot.slane %v893_v58, 3  ;;  %v2654_v6 = vld [vmem:[#allocation7] sm:$0xff] }
 0x19c   : > { %v2572_v8 = vadd.f32 %v794_v55, %v2492_v39  ;;  %v2574_v9 = vadd.f32 %v965_v56, %v810_v50  ;;  %v791_v47 = vsel %vm790_vm3, %v788_v0, %v789_v1  ;;  %v806_v12 = vsel %vm790_vm3, %v789_v1, %v774_v43  ;;  %v2658_v56 = vld [vmem:[#allocation7 + $0x8] sm:$0xff] }
 0x19d   : > { %v2583_v51 = vadd.f32 %v791_v47, %v2504_v60  ;;  %v2586_v16 = vadd.f32 %v806_v12, %v2510_v5  ;;  %v962_v39 = vsel %vm953_vm4, %v943_v36, %v944_v2  ;;  %v792_v50 = vsel %vm790_vm3, %v787_v3, %v788_v0 }
 0x19e   : > { %v2593_v17 = vadd.f32 %v962_v39, %v2520_v11  ;;  %v793_v34 = vsel %vm790_vm3, %v786_v61, %v787_v3  ;;  %v2598_v43 = vadd.f32 %v792_v50, %v2515_v46  ;;  %v963_v60 = vsel %vm953_vm4, %v942_v7, %v943_v36 }
 0x19f   : > { %v2603_v5 = vadd.f32 %v793_v34, %v2507_v63  ;;  %v964_v18 = vsel %vm953_vm4, %v941_v44, %v942_v7  ;;  %v2608_v19 = vadd.f32 %v963_v60, %v2528_v15  ;;  %v1750_v11 = vpop.f32.mrb[28].mxu1  ;;  %v1762_v20 = vpop.f32.mrb[28].mxu0 }
 0x1a0   : > { %v2611_v10 = vadd.f32 %v964_v18, %v2526_v13  ;;  %v947_v21 = vrot.slane %v1750_v11, 3  ;;  %v906_v46 = vpop.f32.mrb[29].mxu1  ;;  %v2613_v25 = vpop.f32.mrb[29].mxu0  ;;  %v1102_v63 = vrot.slane %v1762_v20, 4 }
 0x1a1   : > { %v945_v26 = vrot.slane %v906_v46, 3  ;;  %v1751_v14 = vpop.f32.mrb[30].mxu1  ;;  %v1763_v27 = vpop.f32.mrb[30].mxu0  ;;  %v1100_v41 = vrot.slane %v2613_v25, 4 }
 0x1a2   : > { %v948_v23 = vrot.slane %v1751_v14, 3  ;;  %v1103_v29 = vrot.slane %v1763_v27, 4  ;;  %v909_v30 = vpop.f32.mrb[31].mxu1  ;;  %v1040_v15 = vpop.f32.mrb[31].mxu0 }
 0x1a3   : > { %v961_v33 = vsel %vm953_vm4, %v944_v2, %v945_v26  ;;  %v946_v37 = vrot.slane %v909_v30, 3  ;;  %v1101_v13 = vrot.slane %v1040_v15, 4 }
 0x1a4   : > { %v2619_v40 = vadd.f32 %v961_v33, %v2537_v31  ;;  %v958_v45 = vsel %vm953_vm4, %v947_v21, %v948_v23  ;;  %v1129_v32 = vsel %vm1116_vm5, %v1102_v63, %v1103_v29 }
 0x1a5   : > { %v2632_v53 = vadd.f32 %v958_v45, %v2544_v38  ;;  %v1135_v57 = vadd.f32 %v1129_v32, %v2546_v35  ;;  %v959_v31 = vsel %vm953_vm4, %v946_v37, %v947_v21  ;;  %v960_v59 = vsel %vm953_vm4, %v945_v26, %v946_v37 }
 0x1a6   : > { %v2640_v36 = vadd.f32 %v960_v59, %v2553_v24  ;;  %v2643_v61 = vadd.f32 %v959_v31, %v2555_v42  ;;  %v1130_v44 = vsel %vm1116_vm5, %v1101_v13, %v1102_v63  ;;  %v1131_v38 = vsel %vm1116_vm5, %v1100_v41, %v1101_v13 }
 0x1a7   : > { %v1158_v35 = vadd.f32 %v2629_v52, %v1135_v57  ;;  %v1133_v62 = vadd.f32 %v1131_v38, %v2563_v48  ;;  %v1134_v54 = vadd.f32 %v1130_v44, %v2565_v49  ;;  %v1754_v0 = vpop.f32.mrb[32].mxu1  ;;  %v1766_v24 = vpop.f32.mrb[32].mxu0 }
 0x1a8   : > { %v951_v1 = vrot.slane %v1754_v0, 3  ;;  %v922_v2 = vpop.f32.mrb[33].mxu1  ;;  %v1053_v42 = vpop.f32.mrb[33].mxu0  ;;  %v1106_v12 = vrot.slane %v1766_v24, 4 }
 0x1a9   : > { %v1156_v58 = vadd.f32 %v2629_v52, %v1133_v62  ;;  %v1157_v55 = vadd.f32 %v2629_v52, %v1134_v54  ;;  %v949_v3 = vrot.slane %v922_v2, 3  ;;  %v1755_v7 = vpop.f32.mrb[34].mxu1  ;;  %v1767_v47 = vpop.f32.mrb[34].mxu0  ;;  %v1104_v48 = vrot.slane %v1053_v42, 4 }
 0x1aa   : > { %v952_v39 = vrot.slane %v1755_v7, 3  ;;  %v1107_v49 = vrot.slane %v1767_v47, 4  ;;  %v925_v50 = vpop.f32.mrb[35].mxu1  ;;  %v1056_v34 = vpop.f32.mrb[35].mxu0  ;;  %v1174_v60 = vmax.f32 %v1158_v35, 0.0 }
 0x1ab   : > { %v1172_v18 = vmax.f32 %v1156_v58, 0.0  ;;  %v1173_v11 = vmax.f32 %v1157_v55, 0.0  ;;  %v957_v20 = vsel %vm953_vm4, %v948_v23, %v949_v3  ;;  %v1128_v46 = vsel %vm1116_vm5, %v1103_v29, %v1104_v48 }
 0x1ac   : > { %v2663_v21 = vadd.f32 %v957_v20, %v2572_v8  ;;  %v954_v26 = vsel %vm953_vm4, %v951_v1, %v952_v39  ;;  %v969_v14 = vsel %vm953_vm4, %v952_v39, %v937_v22  ;;  %v1136_v23 = vadd.f32 %v1128_v46, %v2574_v9 }
 0x1ad   : > { %v1190_v27 = vmul.f32 %v2654_v6, %v1172_v18  ;;  %v1191_v63 = vmul.f32 %v2658_v56, %v1173_v11  ;;  %v2677_v8 = vadd.f32 %v954_v26, %v2583_v51  ;;  %v2680_v30 = vadd.f32 %v969_v14, %v2586_v16 }
 0x1ae   : > { %v1125_v29 = vsel %vm1116_vm5, %v1106_v12, %v1107_v49  ;;  %v950_v15 = vrot.slane %v925_v50, 3  ;;  %v1105_v4 = vrot.slane %v1056_v34, 4  ;;  %v1159_v22 = vadd.f32 %v2629_v52, %v1136_v23 }
 0x1af   : > { %v1206_v33 = vmax.f32 %v1190_v27, %v1191_v63  ;;  %v1139_v37 = vadd.f32 %v1125_v29, %v2593_v17  ;;  %v1770_v13 = vpop.f32.mrb[36].mxu0  ;;  %v1192_v38 = vmul.f32 %v2654_v6, %v1174_v60 }
 0x1b0   : > { %v955_v9 = vsel %vm953_vm4, %v950_v15, %v951_v1  ;;  %v956_v51 = vsel %vm953_vm4, %v949_v3, %v950_v15  ;;  %v1126_v16 = vsel %vm1116_vm5, %v1105_v4, %v1106_v12  ;;  %v1127_v45 = vsel %vm1116_vm5, %v1104_v48, %v1105_v4  ;;  %v1069_v32 = vpop.f32.mrb[37].mxu0 }
 0x1b1   : > { %v1207_v57 = vrot.slane %v1206_v33, 4  ;;  %v1175_v31 = vmax.f32 %v1159_v22, 0.0  ;;  %v1162_v59 = vadd.f32 %v2629_v52, %v1139_v37  ;;  %v2696_v17 = vadd.f32 %v956_v51, %v2603_v5  ;;  %v1771_v44 = vpop.f32.mrb[38].mxu0 }
 0x1b2   : > { %v2700_v35 = vadd.f32 %v955_v9, %v2598_v43  ;;  %v1137_v62 = vadd.f32 %v1127_v45, %v2611_v10  ;;  %v1138_v54 = vadd.f32 %v1126_v16, %v2608_v19  ;;  %v1072_v0 = vpop.f32.mrb[39].mxu0  ;;  %v1110_v2 = vrot.slane %v1770_v13, 4 }
 0x1b3   : > { %v1208_v24 = vmax.f32 %v1206_v33, %v1207_v57  ;;  %v1193_v1 = vmul.f32 %v2658_v56, %v1175_v31  ;;  %v1108_v42 = vrot.slane %v1069_v32, 4  ;;  %v1111_v55 = vrot.slane %v1771_v44, 4 }
 0x1b4   : > { %v1160_v58 = vadd.f32 %v2629_v52, %v1137_v62  ;;  %v1161_v5 = vadd.f32 %v2629_v52, %v1138_v54  ;;  %v1109_v3 = vrot.slane %v1072_v0, 4  ;;  %v1178_v43 = vmax.f32 %v1162_v59, 0.0 }
 0x1b5   : > { %v1209_v7 = vrot.slane %v1208_v24, 2  ;;  %v1213_v47 = vmax.f32 %v1192_v38, %v1193_v1  ;;  %v1124_v10 = vsel %vm1116_vm5, %v1107_v49, %v1108_v42  ;;  %v1121_v39 = vsel %vm1116_vm5, %v1110_v2, %v1111_v55 }
 0x1b6   : > { %v1176_v12 = vmax.f32 %v1160_v58, 0.0  ;;  %v1177_v19 = vmax.f32 %v1161_v5, 0.0  ;;  %v1140_v48 = vadd.f32 %v1124_v10, %v2619_v40  ;;  %v1143_v60 = vadd.f32 %v1121_v39, %v2632_v53 }
 0x1b7   : > { %v1210_v50 = vmax.f32 %v1208_v24, %v1209_v7  ;;  %v1214_v34 = vrot.slane %v1213_v47, 4  ;;  %v1122_v18 = vsel %vm1116_vm5, %v1109_v3, %v1110_v2  ;;  %v2715_v11 = vpop.f32.mrb[40].mxu0  ;;  %v1123_v40 = vsel %vm1116_vm5, %v1108_v42, %v1109_v3 }
 0x1b8   : > { %v1194_v20 = vmul.f32 %v2654_v6, %v1176_v12  ;;  %v1195_v49 = vmul.f32 %v2658_v56, %v1177_v19  ;;  %v1163_v46 = vadd.f32 %v2629_v52, %v1140_v48  ;;  %v2722_v26 = vpop.f32.mrb[41].mxu0  ;;  %v1166_v53 = vadd.f32 %v2629_v52, %v1143_v60 }
 0x1b9   : > { %v1211_v14 = vrot.slane %v1210_v50, 1  ;;  %v1215_v27 = vmax.f32 %v1213_v47, %v1214_v34  ;;  %v1141_v63 = vadd.f32 %v1123_v40, %v2640_v36  ;;  %v1775_v23 = vpop.f32.mrb[42].mxu0  ;;  %v1196_v29 = vmul.f32 %v2654_v6, %v1178_v43 }
 0x1ba   : > { %v1220_v15 = vmax.f32 %v1194_v20, %v1195_v49  ;;  %v1179_v4 = vmax.f32 %v1163_v46, 0.0  ;;  %v1142_v33 = vadd.f32 %v1122_v18, %v2643_v61  ;;  %v1088_v22 = vpop.f32.mrb[43].mxu0  ;;  %v1182_v9 = vmax.f32 %v1166_v53, 0.0 }
 0x1bb   : > { %v1212_v37 = vmax.f32 %v1210_v50, %v1211_v14  ;;  %v1216_v13 = vrot.slane %v1215_v27, 2  ;;  %v1164_v51 = vadd.f32 %v2629_v52, %v1141_v63  ;;  %v1112_v36 = vrot.slane %v2722_v26, 4 }
 0x1bc   : > { %v1221_v16 = vrot.slane %v1220_v15, 4  ;;  %v1197_v45 = vmul.f32 %v2658_v56, %v1179_v4  ;;  %v1165_v32 = vadd.f32 %v2629_v52, %v1142_v33  ;;  %v1114_v44 = vrot.slane %v2715_v11, 4 }
 0x1bd   : > { %v1262_v57 = vpack.c.bf16 %v1212_v37, %v1212_v37  ;;  %v1217_v31 = vmax.f32 %v1215_v27, %v1216_v13  ;;  %v1180_v59 = vmax.f32 %v1164_v51, 0.0  ;;  %v1120_v54 = vsel %vm1116_vm5, %v1111_v55, %v1112_v36 }
 0x1be   : > { %v1222_v61 = vmax.f32 %v1220_v15, %v1221_v16  ;;  %v1227_v38 = vmax.f32 %v1196_v29, %v1197_v45  ;;  %v1181_v62 = vmax.f32 %v1165_v32, 0.0  ;;  %v1200_v24 = vmul.f32 %v2654_v6, %v1182_v9 }
 0x1bf   : > { %v1218_v0 = vrot.slane %v1217_v31, 1  ;;  %v1198_v1 = vmul.f32 %v2654_v6, %v1180_v59  ;;  %v1144_v2 = vadd.f32 %v1120_v54, %v2663_v21  ;;  %v1115_v3 = vrot.slane %v1775_v23, 4 }
 0x1c0   : > { %v1223_v42 = vrot.slane %v1222_v61, 2  ;;  %v1228_v58 = vrot.slane %v1227_v38, 4  ;;  %v1199_v5 = vmul.f32 %v2658_v56, %v1181_v62  ;;  %v1301_v7 = vunpack.c.l.b16 %v1262_v57 }
 0x1c1   : > { %v1219_v47 = vmax.f32 %v1217_v31, %v1218_v0  ;;  %v1167_v43 = vadd.f32 %v2629_v52, %v1144_v2  ;;  %v1113_v10 = vrot.slane %v1088_v22, 4  ;;  %v1117_v48 = vsel %vm1116_vm5, %v1114_v44, %v1115_v3 }
 0x1c2   : > { %v1224_v12 = vmax.f32 %v1222_v61, %v1223_v42  ;;  %v1229_v55 = vmax.f32 %v1227_v38, %v1228_v58  ;;  %v1234_v19 = vmax.f32 %v1198_v1, %v1199_v5  ;;  %v1132_v21 = vsel %vm1116_vm5, %v1115_v3, %v1100_v41 }
 0x1c3   : > { %v1263_v39 = vpack.c.bf16 %v1219_v47, %v1219_v47  ;;  %v1183_v50 = vmax.f32 %v1167_v43, 0.0  ;;  %v1147_v34 = vadd.f32 %v1117_v48, %v2677_v8  ;;  %v1148_v20 = vadd.f32 %v1132_v21, %v2680_v30 }
 0x1c4   : > { %v1225_v60 = vrot.slane %v1224_v12, 1  ;;  %v1230_v18 = vrot.slane %v1229_v55, 2  ;;  %v1235_v11 = vrot.slane %v1234_v19, 4  ;;  %v1118_v26 = vsel %vm1116_vm5, %v1113_v10, %v1114_v44 }
 0x1c5   : > { %v1302_v49 = vunpack.c.l.b16 %v1263_v39  ;;  %v1201_v46 = vmul.f32 %v2658_v56, %v1183_v50  ;;  %v1170_v40 = vadd.f32 %v2629_v52, %v1147_v34  ;;  %v1171_v41 = vadd.f32 %v2629_v52, %v1148_v20 }
 0x1c6   : > { %v1226_v14 = vmax.f32 %v1224_v12, %v1225_v60  ;;  %v1231_v25 = vmax.f32 %v1229_v55, %v1230_v18  ;;  %v1236_v27 = vmax.f32 %v1234_v19, %v1235_v11  ;;  %v1119_v30 = vsel %vm1116_vm5, %v1112_v36, %v1113_v10 }
 0x1c7   : > { %v1310_v8 = vsel %vm1309_vm6, %v1302_v49, %v1301_v7  ;;  %v1241_v53 = vmax.f32 %v1200_v24, %v1201_v46  ;;  %v1186_v63 = vmax.f32 %v1170_v40, 0.0  ;;  %v1187_v4 = vmax.f32 %v1171_v41, 0.0 }
 0x1c8   : > { %v1264_v23 = vpack.c.bf16 %v1226_v14, %v1226_v14  ;;  %v1232_v29 = vrot.slane %v1231_v25, 1  ;;  %v1237_v15 = vrot.slane %v1236_v27, 2  ;;  %v1145_v37 = vadd.f32 %v1119_v30, %v2696_v17  ;;  %v1602_v14 = vld [vmem:[%s2822_s5] ss:$0 sm:$0xff] }
 0x1c9   : > { %v1242_v33 = vrot.slane %v1241_v53, 4  ;;  %v1204_v22 = vmul.f32 %v2654_v6, %v1186_v63  ;;  %v1146_v13 = vadd.f32 %v1118_v26, %v2700_v35  ;;  %v1205_v45 = vmul.f32 %v2658_v56, %v1187_v4 }
 0x1ca   : > { %v1303_v9 = vunpack.c.l.b16 %v1264_v23  ;;  %v1233_v51 = vmax.f32 %v1231_v25, %v1232_v29  ;;  %v1238_v16 = vmax.f32 %v1236_v27, %v1237_v15  ;;  %v1168_v28 = vadd.f32 %v2629_v52, %v1145_v37 }
 0x1cb   : > { %v1243_v32 = vmax.f32 %v1241_v53, %v1242_v33  ;;  %v1169_v36 = vadd.f32 %v2629_v52, %v1146_v13  ;;  %v1255_v59 = vmax.f32 %v1204_v22, %v1205_v45 }
 0x1cc   : > { %v1265_v57 = vpack.c.bf16 %v1233_v51, %v1233_v51  ;;  %v1239_v31 = vrot.slane %v1238_v16, 1  ;;  %v1312_v44 = vsel %vm1311_vm7, %v1303_v9, %v1310_v8  ;;  %v1184_v38 = vmax.f32 %v1168_v28, 0.0 }
 0x1cd   : > { %v1244_v61 = vrot.slane %v1243_v32, 2  ;;  %v1185_v17 = vmax.f32 %v1169_v36, 0.0  ;;  %v1256_v54 = vrot.slane %v1255_v59, 4 }
 0x1ce   : > { %v1304_v35 = vunpack.c.l.b16 %v1265_v57  ;;  %v1240_v62 = vmax.f32 %v1238_v16, %v1239_v31  ;;  %v1202_v24 = vmul.f32 %v2654_v6, %v1184_v38 }
 0x1cf   : > { %v1245_v0 = vmax.f32 %v1243_v32, %v1244_v61  ;;  %v1203_v1 = vmul.f32 %v2658_v56, %v1185_v17  ;;  %v1257_v42 = vmax.f32 %v1255_v59, %v1256_v54 }
 0x1d0   : > { %v1266_v2 = vpack.c.bf16 %v1240_v62, %v1240_v62  ;;  %v1314_v52 = vsel %vm1313_vm8, %v1304_v35, %v1312_v44 }
 0x1d1   : > { %v1246_v58 = vrot.slane %v1245_v0, 1  ;;  %v1248_v5 = vmax.f32 %v1202_v24, %v1203_v1  ;;  %v1258_v7 = vrot.slane %v1257_v42, 2 }
 0x1d2   : > { %v1305_v3 = vunpack.c.l.b16 %v1266_v2 }
 0x1d3   : > { %v1247_v47 = vmax.f32 %v1245_v0, %v1246_v58  ;;  %v1249_v43 = vrot.slane %v1248_v5, 4  ;;  %v1259_v10 = vmax.f32 %v1257_v42, %v1258_v7 }
 0x1d4   : > { %v1316_v12 = vsel %vm1315_vm9, %v1305_v3, %v1314_v52 }
 0x1d5   : > { %v1267_v55 = vpack.c.bf16 %v1247_v47, %v1247_v47  ;;  %v1250_v19 = vmax.f32 %v1248_v5, %v1249_v43  ;;  %v1260_v48 = vrot.slane %v1259_v10, 1 }
 0x1d7   : > { %v1306_v39 = vunpack.c.l.b16 %v1267_v55  ;;  %v1251_v6 = vrot.slane %v1250_v19, 2  ;;  %v1261_v21 = vmax.f32 %v1259_v10, %v1260_v48 }
 0x1d9   : > { %v1252_v56 = vmax.f32 %v1250_v19, %v1251_v6  ;;  %v1318_v50 = vsel %vm1317_vm10, %v1306_v39, %v1316_v12  ;;  %v1269_v18 = vpack.c.bf16 %v1261_v21, %v1261_v21 }
 0x1db   : > { %v1253_v34 = vrot.slane %v1252_v56, 1  ;;  %v1308_v49 = vunpack.c.l.b16 %v1269_v18 }
 0x1dd   : > { %v1254_v60 = vmax.f32 %v1252_v56, %v1253_v34 }
 0x1df   : > { %v1268_v11 = vpack.c.bf16 %v1254_v60, %v1254_v60 }
 0x1e1   : > { %v1307_v20 = vunpack.c.l.b16 %v1268_v11 }
 0x1e3   : > { %v1320_v46 = vsel %vm1319_vm11, %v1307_v20, %v1318_v50 }
 0x1e4   : > { %v1322_v40 = vsel %vm1321_vm12, %v1308_v49, %v1320_v46 }
 0x1e5   : > { %v1323_v26 = vpack.c.b16 %v1322_v40, %v1322_v40 }
 0x1e7   : > { %1793 = vmatmul.mubr.bf16.vlgmr.msra.gmra.mrb[36].mxu1 %v1323_v26 }
 0x2ba   : > { %v1407_v25 = vpop.f32.mrb[36].mxu1 }
 0x2bb   : > { %v1408_v27 = vadd.f32 %v1602_v14, %v1407_v25  ;;  %v1794_v41 = vpop.f32.mrb[37].mxu1 }
 0x2bc   : > { %v1410_v8 = vpop.f32.mrb[38].mxu1 }
 0x2bd   : > { %1413 = vst [vmem:[%s314_s1] sm:$0xff] %v1408_v27  ;;  %v1795_v53 = vpop.f32.mrb[39].mxu1 }
 0x2be   : > { %2036 = shalt.err (!%p2033_p4)
}
 0x2bf   : > { %s2037_s16 = scalar_lea.hbm %s2773_s8, 128  ;;  %s2041_s20 = scalar_lea.hbm %s2823_s6, 256 }
 0x2c0   : > { %p2038_p9 = scmp.ne.s32.totalorder %s2773_s8, %s2037_s16  ;;  %p2042_p8 = scmp.lt.u32.totalorder %s2773_s8, %s2823_s6 }
 0x2c1   : > { %p2043_p13 = scmp.lt.u32.totalorder %s2041_s20, %s2037_s16  ;;  %p2045_p10 = scmp.lt.u32.totalorder %s2037_s16, %s2773_s8 }
 0x2c2   : > { %p2039_p0 = pnand %p2038_p9, %p2293_p5 }
 0x2c3   : > { %p2044_p6 = por %p2043_p13, %p2042_p8 }
 0x2c4   : > { %p2040_p11 = pneg %p2039_p0 }
 0x2c5   : > { %p2046_p3 = por %p2045_p10, %p2044_p6 }
 0x2c7   : > { %p2047_p7 = pnand %p2046_p3, %p2040_p11 }
 0x2c9   : > { %2050 = shalt.err (!%p2047_p7)
}
 0x2ca   : > { %1814 = dma.vmem_to_hbm [thread:$0]  (%p2293_p5), %s2775_s26, 128, %s2773_s8, %s1415_s12  }
 0x2cb PF: > { %s1440_s10 = sand.u32 1, %s2085_s21   ;;  %p2849_p12 = scmp.ne.s32.totalorder %s2833_s28, 0 }
 0x2cc   : > { %p2850_p1 = scmp.ge.s32.totalorder %s2097_s24, 2  ;;  %s1441_s1 = scalar_lea.sflag [#allocation4], %s1440_s10 }
 0x2ce   : > { %p1831_p2 = pnand %p2850_p1, %p2849_p12 }
 0x2d0   : > { %2080 = dma.done.wait (!%p1831_p2), %s1441_s1, 128  }
 0x2d1   : > { %2082 = vsyncadd (!%p1831_p2), %s1441_s1, 4294967168  ;;  %p21_p4 = scmp.ge.s32.totalorder %s2258_s14, 4   ;;  %s2851_s21 = smov %s2089_s22 }
 0x2d2   : > { %s2852_s22 = smov %s2093_s23  ;;  %s2853_s23 = smov %s2289_s30 }
 0x2d3   : > { %s2854_s24 = smov %s2258_s14  ;;  %23 = sbr.rel (!%p21_p4) target bundleno = 9 (0x9), region = 105 }
 0x2da   :  { %1446 = vsyncpa [#allocation3], 1 }
 0x2db   :  { %1448 = vsyncpa [#allocation3 + $0x1], 1 }
 0x2dc   :  { %1449 = vsyncpa [#allocation6], 1 }
 0x2dd   :  { %1450 = vsyncpa [#allocation9], 1 }
 0x2de   :  { %1451 = vsyncpa [#allocation4], 1 }
 0x2df   :  { %1453 = vsyncpa [#allocation4 + $0x1], 1 }

// kernel: tpu_custom_call.1
= control target key start
LH: loop header
LB: loop body
LE: loop exit
PB: predicated region body
PF: predicated region fallthrough
CT: control target
= control target key end

     0   :  { %s2817_s0 = inlined_call_operand.hbm [shape: bf16[16,16,32], index: 0, kind: input, shape index: {}]   ;;  %s2818_s1 = inlined_call_operand.hbm [shape: bf16[5,32,128], index: 1, kind: input, shape index: {}]   ;;  %s2819_s2 = inlined_call_operand.vmem [shape: f32[1,128], index: 2, kind: input, shape index: {}]   ;;  %s2820_s3 = inlined_call_operand.hbm [shape: f32[16,128], index: 3, kind: input, shape index: {}]   ;;  %s2821_s4 = inlined_call_operand.hbm [shape: bf16[128,128], index: 4, kind: input, shape index: {}]   ;;  %s2822_s5 = inlined_call_operand.vmem [shape: f32[1,128], index: 5, kind: input, shape index: {}]   ;;  %s2823_s6 = inlined_call_operand.hbm [shape: f32[16,128], index: 6, kind: output, shape index: {}]  }
   0x1   :  { %2831 = sst [smem:[#allocation15_spill]] %s2818_s1 }
   0x2   :  { %11 = vsyncpa [#allocation3], 0 }
   0x3   :  { %13 = vsyncpa [#allocation3 + $0x1], 0 }
   0x4   :  { %14 = vsyncpa [#allocation6], 0 }
   0x5   :  { %15 = vsyncpa [#allocation9], 0 }
   0x6   :  { %16 = vsyncpa [#allocation4], 0 }
   0x7   :  { %18 = vsyncpa [#allocation4 + $0x1], 0  ;;  %s2145_s21 = smov 0   ;;  %s2147_s22 = smov 0  }
   0x8   :  { %s2149_s23 = smov 0   ;;  %s2151_s24 = smov 0  }
   0x9 LB: > { %s2166_s25 = sadd.s32 4294967295, %s2097_s24   ;;  %s1527_s26 = sadd.s32 4294967294, %s2097_s24   ;;  %s2097_s24 = sphi %s2151_s24, %s2854_s24   ;;  %s2093_s23 = sphi %s2149_s23, %s2853_s23   ;;  %s2089_s22 = sphi %s2147_s22, %s2852_s22   ;;  %s2085_s21 = sphi %s2145_s21, %s2851_s21  }
   0xa   : > { %p44_p0 = scmp.ne.s32.totalorder %s2089_s22, %s2085_s21  ;;  %p2824_p1 = scmp.eq.s32.totalorder %s2166_s25, 0 }
   0xb   : > { %p179_p3 = scmp.eq.s32.totalorder %s1527_s26, 1  ;;  %p1528_p5 = scmp.ge.s32.totalorder %s2097_s24, 1 }
   0xc   : > { %p2175_p4 = por %p2824_p1, %p44_p0  ;;  %p186_p7 = scmp.lt.s32.totalorder %s2097_s24, 3 }
   0xd   : > { %p2180_p6 = por %p179_p3, %p44_p0  ;;  %s2099_s30 = smov [#allocation5]  }
   0xe   : > { %s2832_s27 = scalar_select %p2175_p4, 1, 0 }
   0xf   : > { %s2833_s28 = scalar_select %p2180_p6, 1, 0 }
  0x10   : > { %p2185_p8 = pnand %p1528_p5, %p186_p7  ;;  %s198_s7 = sshll.u32 %s2099_s30, 4  ;;  %s2189_s7 = int_to_ptr.vmem [resolvable:$true] %s198_s7 }
  0x11   : > { %s2100_s9 = smov [#allocation7]   ;;  %s2836_s1 = sld [smem:[#allocation15_spill]] }
  0x12   : > { %s2834_s29 = scalar_select %p2185_p8, 1, 0 }
  0x13   : > { %p1816_p9 = pneg %p2185_p8  ;;  %s214_s10 = sshll.u32 %s2100_s9, 4  ;;  %s2200_s10 = int_to_ptr.vmem [resolvable:$true] %s214_s10 }
  0x15   : > { %p2196_p11 = pnand %p1816_p9, %p2824_p1 }
  0x17   : > { %s1909_s13 = scalar_lea.hbm %s2836_s1, 1280  ;;  %p2210_p13 = pneg %p2196_p11 }
  0x18   : > { %p1910_p12 = scmp.ne.s32.totalorder %s2836_s1, %s1909_s13  ;;  %p1916_p5 = scmp.lt.u32.totalorder %s1909_s13, %s2836_s1 }
  0x1a   : > { %p1912_p0 = pnand %p2210_p13, %p1910_p12 }
  0x1c   : > { %p1913_p3 = pneg %p1912_p0 }
  0x1e   : > { %p1918_p7 = pnand %p1916_p5, %p1913_p3 }
  0x20   : > { %1921 = shalt.err (!%p1918_p7)
}
  0x21   : > { %s1922_s19 = scalar_lea.vmem %s2189_s7, 1280  ;;  %p1930_p2 = scmp.lt.s32.totalorder %s2189_s7, %s2189_s7 }
  0x22   : > { %p1923_p9 = scmp.ne.s32.totalorder %s2189_s7, %s1922_s19  ;;  %p1931_p6 = scmp.lt.s32.totalorder %s1922_s19, %s1922_s19 }
  0x24   : > { %p1925_p10 = pnand %p1923_p9, %p2210_p13  ;;  %p1932_p12 = por %p1931_p6, %p1930_p2 }
  0x26   : > { %p1926_p1 = pneg %p1925_p10 }
  0x28   : > { %p1933_p0 = pnand %p1932_p12, %p1926_p1 }
  0x2a   : > { %1936 = shalt.err (!%p1933_p0)
}
  0x2b   : > { %s2825_s20 = smov 64   ;;  %s2827_s26 = smov 4  }
  0x2c   : > { %1819 = dma.hbm_to_vmem [thread:$0]  (!%p2196_p11), %s2836_s1, 1280, %s2189_s7, [#allocation6], %s2825_s20, %s2825_s20, %s2827_s26  }
  0x2d   : > { %s1937_s13 = scalar_lea.hbm %s2820_s3, 256 }
  0x2e   : > { %p1938_p1 = scmp.ne.s32.totalorder %s2820_s3, %s1937_s13  ;;  %p1944_p10 = scmp.lt.u32.totalorder %s1937_s13, %s2820_s3 }
  0x30   : > { %p1940_p2 = pnand %p1938_p1, %p2210_p13 }
  0x32   : > { %p1941_p6 = pneg %p1940_p2 }
  0x34   : > { %p1946_p3 = pnand %p1944_p10, %p1941_p6 }
  0x36   : > { %1949 = shalt.err (!%p1946_p3)
}
  0x37   : > { %s1950_s7 = scalar_lea.vmem %s2200_s10, 256  ;;  %p1958_p12 = scmp.lt.s32.totalorder %s2200_s10, %s2200_s10 }
  0x38   : > { %p1951_p5 = scmp.ne.s32.totalorder %s2200_s10, %s1950_s7  ;;  %p1959_p0 = scmp.lt.s32.totalorder %s1950_s7, %s1950_s7 }
  0x3a   : > { %p1953_p7 = pnand %p1951_p5, %p2210_p13  ;;  %p1960_p1 = por %p1959_p0, %p1958_p12 }
  0x3c   : > { %p1954_p9 = pneg %p1953_p7 }
  0x3e   : > { %p1961_p2 = pnand %p1960_p1, %p1954_p9 }
  0x40   : > { %1964 = shalt.err (!%p1961_p2)
}
  0x41   : > { %s2103_s19 = smov 128   ;;  %s2104_s30 = smov 8  }
  0x42   : > { %1822 = dma.hbm_to_vmem [thread:$0]  (!%p2196_p11), %s2820_s3, 256, %s2200_s10, [#allocation6], %s2103_s19, %s2103_s19, %s2104_s30  }
  0x43   : > { %s2105_s12 = smov [#allocation8]   ;;  %s2258_s14 = sadd.s32 1, %s2097_s24  }
  0x44   : > { %s227_s13 = sshll.u32 %s2105_s12, 4  ;;  %s1965_s18 = scalar_lea.hbm %s2821_s4, 1024  ;;  %s228_s13 = int_to_ptr.vmem [resolvable:$true] %s227_s13 }
  0x45   : > { %p1966_p6 = scmp.ne.s32.totalorder %s2821_s4, %s1965_s18  ;;  %p1972_p5 = scmp.lt.u32.totalorder %s1965_s18, %s2821_s4 }
  0x47   : > { %p1968_p10 = pnand %p1966_p6, %p2210_p13 }
  0x49   : > { %p1969_p3 = pneg %p1968_p10 }
  0x4b   : > { %p1974_p7 = pnand %p1972_p5, %p1969_p3 }
  0x4d   : > { %1977 = shalt.err (!%p1974_p7)
}
  0x4e   : > { %s1978_s10 = scalar_lea.vmem %s228_s13, 1024  ;;  %p1986_p1 = scmp.lt.s32.totalorder %s228_s13, %s228_s13 }
  0x4f   : > { %p1979_p9 = scmp.ne.s32.totalorder %s228_s13, %s1978_s10  ;;  %p1987_p2 = scmp.lt.s32.totalorder %s1978_s10, %s1978_s10 }
  0x51   : > { %p1981_p12 = pnand %p1979_p9, %p2210_p13  ;;  %p1988_p4 = por %p1987_p2, %p1986_p1 }
  0x53   : > { %p1982_p0 = pneg %p1981_p12 }
  0x55   : > { %p1989_p8 = pnand %p1988_p4, %p1982_p0 }
  0x57   : > { %1992 = shalt.err (!%p1989_p8)
}
  0x58   : > { %s2838_s20 = smov 4   ;;  %s2839_s19 = smov 64  }
  0x59   : > { %1825 = dma.hbm_to_vmem [thread:$0]  (!%p2196_p11), %s2821_s4, 1024, %s228_s13, [#allocation9], %s2839_s19, %s2839_s19, %s2838_s20  }
  0x5a   : > { %s28_s16 = ssub.s32 %s2097_s24, %s2258_s14  ;;  %s31_s8 = sadd.s32 1, %s2093_s23 }
  0x5b   : > { %p29_p4 = scmp.eq.s32.totalorder %s28_s16, 0  ;;  %p38_p8 = scmp.ne.s32.totalorder %s2093_s23, %s2089_s22 }
  0x5c   : > { %p39_p13 = scmp.eq.s32.totalorder %s2097_s24, 0  ;;  %p1837_p6 = scmp.lt.s32.totalorder %s2097_s24, 2 }
  0x5d   : > { %s2289_s30 = scalar_select %p29_p4, %s2093_s23, %s31_s8  }
  0x5e   : > { %p40_p10 = por %p39_p13, %p38_p8  ;;  %p2840_p3 = scmp.eq.s32.totalorder %s2166_s25, 1 }
  0x5f   : > { %s244_s11 = sand.u32 1, %s2093_s23   ;;  %s1616_s12 = sshll.u32 %s2097_s24, 10 }
  0x60   : > { %p2293_p5 = por %p2840_p3, %p38_p8  ;;  %s1533_s15 = sshll.u32 %s244_s11, 6 }
  0x61   : > { %s2302_s13 = scalar_lea.hbm %s2817_s0, %s1616_s12  ;;  %s248_s7 = scalar_lea.vmem [#allocation2], %s1533_s15 }
  0x62   : > { %s256_s10 = sshll.u32 %s248_s7, 4  ;;  %p2304_p11 = pnand %p1837_p6, %p40_p10  ;;  %s2308_s10 = int_to_ptr.vmem [resolvable:$true] %s256_s10 }
  0x63   : > { %s2310_s26 = scalar_lea.sflag [#allocation3], %s244_s11  ;;  %s1993_s16 = scalar_lea.hbm %s2302_s13, 1024 }
  0x64   : > { %p1994_p7 = scmp.ne.s32.totalorder %s2302_s13, %s1993_s16  ;;  %p1995_p9 = pneg %p2304_p11 }
  0x65   : > { %s1998_s15 = scalar_lea.hbm %s2817_s0, 2048  ;;  %p1999_p1 = scmp.lt.u32.totalorder %s2302_s13, %s2817_s0 }
  0x66   : > { %p1996_p12 = pnand %p1995_p9, %p1994_p7  ;;  %p2000_p2 = scmp.lt.u32.totalorder %s1998_s15, %s1993_s16 }
  0x67   : > { %p2002_p8 = scmp.lt.u32.totalorder %s1993_s16, %s2302_s13 }
  0x68   : > { %p1997_p0 = pneg %p1996_p12  ;;  %p2001_p4 = por %p2000_p2, %p1999_p1 }
  0x6a   : > { %p2003_p13 = por %p2002_p8, %p2001_p4 }
  0x6c   : > { %p2004_p6 = pnand %p2003_p13, %p1997_p0 }
  0x6e   : > { %2007 = shalt.err (!%p2004_p6)
}
  0x6f   : > { %s2008_s11 = scalar_lea.vmem %s2308_s10, 1024  ;;  %s2106_s7 = smov [#allocation2]  }
  0x70   : > { %p2009_p10 = scmp.ne.s32.totalorder %s2308_s10, %s2008_s11  ;;  %s2013_s8 = sshll.u32 %s2106_s7, 4  ;;  %s2014_s8 = int_to_ptr.vmem [resolvable:$false] %s2013_s8 }
  0x71   : > { %s2015_s12 = scalar_lea.vmem %s2014_s8, 2048  ;;  %p2016_p12 = scmp.lt.s32.totalorder %s2308_s10, %s2014_s8 }
  0x72   : > { %p2011_p3 = pnand %p2009_p10, %p1995_p9  ;;  %p2017_p1 = scmp.lt.s32.totalorder %s2015_s12, %s2008_s11 }
  0x74   : > { %p2012_p7 = pneg %p2011_p3  ;;  %p2018_p2 = por %p2017_p1, %p2016_p12 }
  0x76   : > { %p2019_p4 = pnand %p2018_p2, %p2012_p7 }
  0x78   : > { %2022 = shalt.err (!%p2019_p4)
}
  0x79   : > { %1829 = dma.hbm_to_vmem [thread:$0]  (!%p2304_p11), %s2302_s13, 1024, %s2308_s10, %s2310_s26, %s2839_s19, %s2839_s19, %s2838_s20  }
  0x7a   : > { %p2843_p9 = scmp.ne.s32.totalorder %s2834_s29, 0 }
  0x7b   : > { %s2344_s16 = sand.u32 (!%p2843_p9), 1, %s2089_s22   ;;  %p2844_p0 = scmp.ne.s32.totalorder (!%p2843_p9), %s2832_s27, 0 }
  0x7c   : > { %268 = sbr.rel (%p2843_p9) target bundleno = 715 (0x2cb), region = 44  ;;  %s1538_s15 = sshll.u32 (!%p2843_p9), %s2344_s16, 6 }
  0x7d   : > { %s271_s17 = scalar_lea.sflag (!%p2843_p9), [#allocation3], %s2344_s16  ;;  %s2348_s18 = scalar_lea.vmem (!%p2843_p9), [#allocation2], %s1538_s15 }
  0x83   : > { %2068 = dma.done.wait (%p2844_p0), %s271_s17, 1024  }
  0x84   : > { %2070 = vsyncadd (%p2844_p0), %s271_s17, 4294966272  ;;  %p2845_p11 = scmp.eq.s32.totalorder %s2166_s25, 0 }
  0x86   : > { %2072 = dma.done.wait (%p2845_p11), [#allocation6], 1536   ;;  %p2846_p8 = pmov %p2845_p11 }
  0x88   : > { %2074 = vsyncadd (%p2846_p8), [#allocation6], 4294965760  ;;  %p2847_p13 = pmov %p2846_p8 }
  0x89   : > { %p2848_p6 = pmov %p2846_p8 }
  0x8a   : > { %2076 = dma.done.wait (%p2847_p13), [#allocation9], 1024  }
  0x8b   : > { %2078 = vsyncadd (%p2848_p6), [#allocation9], 4294966272  ;;  %v1883_v0 = vld [vmem:[#allocation5 + $0x10] sm:$0xff]   ;;  %v1884_v1 = vld [vmem:[#allocation5 + $0x18] sm:$0xff]   ;;  %vm394_vm0 = vcmask 261120   ;;  %v2107_v19 = vmov 0.0   ;;  %v532_v26 = vlaneseq }
  0x8c   : > { %1676 = vmatprep.subr.bf16.mxu0 %v1883_v0  ;;  %1796 = vmatprep.subr.bf16.mxu1 %v1883_v0  ;;  %v2363_v2 = vld [vmem:[%s2348_s18] sm:$0xff]   ;;  %v2366_v3 = vld [vmem:[%s2348_s18 + $0x30] sm:$0xff]   ;;  %v2369_v4 = vld [vmem:[%s2348_s18 + $0x8] sm:$0xff]   ;;  %vm2108_vm1 = vmmov 0   ;;  %vm1309_vm6 = vcmask 1041409   ;;  %vm1311_vm7 = vcmask 1042434  }
  0x8d   : > { %1677 = vmatpush3.bf16.msra.mxu0 %v1883_v0  ;;  %1798 = vmatpush3.bf16.msra.mxu1 %v1883_v0  ;;  %v2376_v5 = vld [vmem:[%s2348_s18 + $0x38] sm:$0xff]   ;;  %v1889_v6 = vld [vmem:[#allocation5] sm:$0xff]   ;;  %v1891_v8 = vld [vmem:[#allocation5 + $0x8] sm:$0xff]   ;;  %v2438_v28 = vshrl.u32 %v532_v26, 7  ;;  %vm1313_vm8 = vcmask 1043459   ;;  %vm1315_vm9 = vcmask 1044484  }
  0x8e   : > { %1678 = vmatprep.subr.bf16.mxu0 %v1884_v1  ;;  %1797 = vmatprep.subr.bf16.mxu1 %v1884_v1  ;;  %v1890_v7 = vld [vmem:[#allocation5 + $0x20] sm:$0xff]   ;;  %v1892_v9 = vld [vmem:[%s2348_s18 + $0x10] sm:$0xff]   ;;  %v1894_v10 = vld [vmem:[#allocation5 + $0x28] sm:$0xff]   ;;  %vm1317_vm10 = vcmask 1045509   ;;  %vm1319_vm11 = vcmask 1046534   ;;  %vm1321_vm12 = vcmask 1047559  }
  0x8f   : > { %1680 = vmatprep.mubr.msk.bf16.mxu0 %vm394_vm0, %v2363_v2  ;;  %1692 = vmatprep.mubr.msk.bf16.mxu1 %vm394_vm0, %v2366_v3  ;;  %v1893_v11 = vld [vmem:[%s2348_s18 + $0x18] sm:$0xff]   ;;  %v1895_v12 = vld [vmem:[%s2348_s18 + $0x20] sm:$0xff]   ;;  %v1897_v13 = vld [vmem:[#allocation5 + $0x30] sm:$0xff]   ;;  %vm534_vm2 = vcmp.lt.s32.totalorder %v2438_v28, 7  ;;  %vm790_vm3 = vcmp.lt.s32.totalorder %v2438_v28, 6  ;;  %vm953_vm4 = vcmp.lt.s32.totalorder %v2438_v28, 5 }
  0x90   : > { %v1898_v14 = vld [vmem:[#allocation5 + $0x40] sm:$0xff]   ;;  %v1899_v15 = vld [vmem:[#allocation5 + $0x38] sm:$0xff]   ;;  %v1896_v16 = vld [vmem:[%s2348_s18 + $0x28] sm:$0xff]   ;;  %vm1116_vm5 = vcmp.lt.s32.totalorder %v2438_v28, 4  ;;  %s1542_s20 = sshll.u32 %s2344_s16, 3  ;;  %s1612_s10 = sshll.u32 %s2166_s25, 7 }
  0x91   : > { %1679 = vmatpush3.bf16.msra.mxu0 %v1884_v1  ;;  %1799 = vmatpush3.bf16.msra.mxu1 %v1884_v1  ;;  %v1900_v17 = vld [vmem:[#allocation5 + $0x48] sm:$0xff]   ;;  %v1901_v18 = vld [vmem:[#allocation8] sm:$0xff]   ;;  %v1903_v21 = vld [vmem:[#allocation8 + $0x10] sm:$0xff]   ;;  %s314_s1 = scalar_lea.vmem [#allocation10], %s1542_s20  ;;  %s2773_s8 = scalar_lea.hbm %s2823_s6, %s1612_s10 }
  0x92   : > { %1696 = vmatprep.subr.bf16.mxu1 %v1889_v6  ;;  %1716 = vmatprep.subr.bf16.mxu0 %v1890_v7  ;;  %v1902_v20 = vld [vmem:[#allocation8 + $0x8] sm:$0xff]   ;;  %v1904_v22 = vld [vmem:[#allocation8 + $0x18] sm:$0xff]   ;;  %v1905_v23 = vld [vmem:[#allocation8 + $0x20] sm:$0xff]   ;;  %s1428_s26 = sshll.u32 %s314_s1, 4  ;;  %s1415_s12 = scalar_lea.sflag [#allocation4], %s2344_s16  ;;  %s2775_s26 = int_to_ptr.vmem [resolvable:$true] %s1428_s26 }
  0x93   : > { %v1906_v24 = vld [vmem:[#allocation8 + $0x28] sm:$0xff]   ;;  %v1907_v25 = vld [vmem:[#allocation8 + $0x30] sm:$0xff]   ;;  %v1908_v27 = vld [vmem:[#allocation8 + $0x38] sm:$0xff]   ;;  %s2023_s25 = scalar_lea.vmem %s2775_s26, 128  ;;  %s2109_s15 = smov [#allocation10]  }
  0x94   : > { %1681 = vmatmul.mubr.msk.bf16.vlgmr.msra.gmra.mrb[0].mxu0 %vm394_vm0, %v2369_v4  ;;  %1693 = vmatmul.mubr.msk.bf16.vlgmr.msra.gmra.mrb[0].mxu1 %vm394_vm0, %v2376_v5  ;;  %p2024_p10 = scmp.ne.s32.totalorder %s2775_s26, %s2023_s25  ;;  %s2027_s17 = sshll.u32 %s2109_s15, 4  ;;  %s2028_s17 = int_to_ptr.vmem [resolvable:$false] %s2027_s17 }
  0x95   : > { %1697 = vmatpush3.bf16.msra.mxu1 %v1889_v6  ;;  %1717 = vmatpush3.bf16.msra.mxu0 %v1890_v7  ;;  %s2029_s18 = scalar_lea.vmem %s2028_s17, 256  ;;  %p2030_p12 = scmp.lt.s32.totalorder %s2775_s26, %s2028_s17 }
  0x96   : > { %1698 = vmatprep.subr.bf16.mxu1 %v1891_v8  ;;  %1684 = vmatprep.mubr.msk.bf16.mxu0 %vm394_vm0, %v1892_v9  ;;  %p2025_p3 = pnand %p2024_p10, %p2293_p5  ;;  %p2031_p1 = scmp.lt.s32.totalorder %s2029_s18, %s2023_s25 }
  0x97   : > { %1700 = vmatprep.mubr.msk.bf16.mxu1 %vm394_vm0, %v2363_v2  ;;  %1718 = vmatprep.subr.bf16.mxu0 %v1894_v10 }
  0x98   : > { %p2026_p7 = pneg %p2025_p3  ;;  %p2032_p2 = por %p2031_p1, %p2030_p12 }
  0x99   : > { %1699 = vmatpush3.bf16.msra.mxu1 %v1891_v8  ;;  %1719 = vmatpush3.bf16.msra.mxu0 %v1894_v10 }
  0x9a   : > { %1736 = vmatprep.subr.bf16.mxu1 %v1897_v13  ;;  %1756 = vmatprep.subr.bf16.mxu0 %v1898_v14  ;;  %p2033_p4 = pnand %p2032_p2, %p2026_p7 }
  0x9c   : > { %1685 = vmatmul.mubr.msk.bf16.gmra.mrb[4].mxu0 %vm394_vm0, %v1893_v11  ;;  %1701 = vmatmul.mubr.msk.bf16.vlgmr.msra.gmra.mrb[4].mxu1 %vm394_vm0, %v2369_v4 }
  0x9d   : > { %1688 = vmatprep.mubr.msk.bf16.mxu0 %vm394_vm0, %v1895_v12  ;;  %1704 = vmatprep.mubr.msk.bf16.mxu1 %vm394_vm0, %v1892_v9 }
  0x9e   : > { %1737 = vmatpush3.bf16.msra.mxu1 %v1897_v13 }
  0x9f   : > { %1738 = vmatprep.subr.bf16.mxu1 %v1899_v15 }
  0xa2   : > { %1739 = vmatpush3.bf16.msra.mxu1 %v1899_v15 }
  0xa3   : > { %1776 = vmatprep.subr.bf16.mxu1 %v2107_v19 }
  0xa4   : > { %1689 = vmatmul.mubr.msk.bf16.gmra.mrb[8].mxu0 %vm394_vm0, %v1896_v16  ;;  %1705 = vmatmul.mubr.msk.bf16.gmra.mrb[8].mxu1 %vm394_vm0, %v1893_v11 }
  0xa5   : > { %1708 = vmatprep.mubr.msk.bf16.mxu1 %vm394_vm0, %v1895_v12  ;;  %1720 = vmatprep.mubr.msk.bf16.mxu0 %vm394_vm0, %v2363_v2 }
  0xac   : > { %1709 = vmatmul.mubr.msk.bf16.gmra.mrb[12].mxu1 %vm394_vm0, %v1896_v16  ;;  %1721 = vmatmul.mubr.msk.bf16.vlgmr.msra.gmra.mrb[12].mxu0 %vm394_vm0, %v2369_v4 }
  0xad   : > { %1757 = vmatpush3.bf16.msra.mxu0 %v1898_v14  ;;  %1712 = vmatprep.mubr.msk.bf16.mxu1 %vm394_vm0, %v2366_v3 }
  0xae   : > { %1724 = vmatprep.mubr.msk.bf16.mxu0 %vm394_vm0, %v1892_v9  ;;  %1758 = vmatprep.subr.bf16.mxu0 %v1900_v17 }
  0xb1   : > { %1759 = vmatpush3.bf16.msra.mxu0 %v1900_v17 }
  0xb4   : > { %1713 = vmatmul.mubr.msk.bf16.gmra.mrb[16].mxu1 %vm394_vm0, %v2376_v5  ;;  %1725 = vmatmul.mubr.msk.bf16.gmra.mrb[16].mxu0 %vm394_vm0, %v1893_v11 }
  0xb5   : > { %1728 = vmatprep.mubr.msk.bf16.mxu0 %vm394_vm0, %v1895_v12  ;;  %1740 = vmatprep.mubr.msk.bf16.mxu1 %vm394_vm0, %v2363_v2 }
  0xbc   : > { %1729 = vmatmul.mubr.msk.bf16.gmra.mrb[20].mxu0 %vm394_vm0, %v1896_v16  ;;  %1741 = vmatmul.mubr.msk.bf16.vlgmr.msra.gmra.mrb[20].mxu1 %vm394_vm0, %v2369_v4 }
  0xbd   : > { %1732 = vmatprep.mubr.msk.bf16.mxu0 %vm394_vm0, %v2366_v3  ;;  %1744 = vmatprep.mubr.msk.bf16.mxu1 %vm394_vm0, %v1892_v9 }
  0xbe   : > { %1777 = vmatpush3.bf16.msra.mxu1 %v1901_v18 }
  0xbf   : > { %1778 = vmatprep.subr.bf16.mxu1 %v2107_v19 }
  0xc2   : > { %1779 = vmatpush3.bf16.msra.mxu1 %v1902_v20 }
  0xc3   : > { %1780 = vmatprep.subr.bf16.mxu1 %v2107_v19 }
  0xc4   : > { %1733 = vmatmul.mubr.msk.bf16.gmra.mrb[24].mxu0 %vm394_vm0, %v2376_v5  ;;  %1745 = vmatmul.mubr.msk.bf16.gmra.mrb[24].mxu1 %vm394_vm0, %v1893_v11 }
  0xc5   : > { %1748 = vmatprep.mubr.msk.bf16.mxu1 %vm394_vm0, %v1895_v12  ;;  %1760 = vmatprep.mubr.msk.bf16.mxu0 %vm394_vm0, %v2363_v2 }
  0xc6   : > { %1781 = vmatpush3.bf16.msra.mxu1 %v1903_v21 }
  0xc7   : > { %1782 = vmatprep.subr.bf16.mxu1 %v2107_v19 }
  0xca   : > { %1783 = vmatpush3.bf16.msra.mxu1 %v1904_v22 }
  0xcb   : > { %1784 = vmatprep.subr.bf16.mxu1 %v2107_v19 }
  0xcc   : > { %1749 = vmatmul.mubr.msk.bf16.gmra.mrb[28].mxu1 %vm394_vm0, %v1896_v16  ;;  %1761 = vmatmul.mubr.msk.bf16.vlgmr.msra.gmra.mrb[28].mxu0 %vm394_vm0, %v2369_v4 }
  0xcd   : > { %1752 = vmatprep.mubr.msk.bf16.mxu1 %vm394_vm0, %v2366_v3  ;;  %1764 = vmatprep.mubr.msk.bf16.mxu0 %vm394_vm0, %v1892_v9 }
  0xce   : > { %1785 = vmatpush3.bf16.msra.mxu1 %v1905_v23 }
  0xcf   : > { %1786 = vmatprep.subr.bf16.mxu1 %v2107_v19 }
  0xd2   : > { %1787 = vmatpush3.bf16.msra.mxu1 %v1906_v24 }
  0xd3   : > { %1788 = vmatprep.subr.bf16.mxu1 %v2107_v19 }
  0xd4   : > { %1753 = vmatmul.mubr.msk.bf16.gmra.mrb[32].mxu1 %vm394_vm0, %v2376_v5  ;;  %1765 = vmatmul.mubr.msk.bf16.gmra.mrb[32].mxu0 %vm394_vm0, %v1893_v11 }
  0xd5   : > { %1768 = vmatprep.mubr.msk.bf16.mxu0 %vm394_vm0, %v1895_v12  ;;  %1792 = vmatprep.mubr.msk.bf16.mxu1 %vm2108_vm1, %v2107_v19 }
  0xd6   : > { %1789 = vmatpush3.bf16.msra.mxu1 %v1907_v25 }
  0xd7   : > { %1790 = vmatprep.subr.bf16.mxu1 %v2107_v19 }
  0xda   : > { %1791 = vmatpush3.bf16.msra.mxu1 %v1908_v27 }
  0xdc   : > { %1769 = vmatmul.mubr.msk.bf16.gmra.mrb[36].mxu0 %vm394_vm0, %v1896_v16 }
  0xdd   : > { %1772 = vmatprep.mubr.msk.bf16.mxu0 %vm394_vm0, %v2366_v3 }
  0xe4   : > { %1773 = vmatmul.mubr.msk.bf16.gmra.mrb[40].mxu0 %vm394_vm0, %v2376_v5 }
 0x167   : > { %v1682_v29 = vpop.f32.mrb[0].mxu0  ;;  %v1694_v30 = vpop.f32.mrb[0].mxu1 }
 0x168   : > { %v530_v31 = vrot.slane %v1694_v30, 1  ;;  %v453_v32 = vpop.f32.mrb[1].mxu0  ;;  %v501_v33 = vpop.f32.mrb[1].mxu1  ;;  %v518_v38 = vrot.slane %v1682_v29, 1 }
 0x169   : > { %v516_v34 = vrot.slane %v453_v32, 1  ;;  %v528_v35 = vrot.slane %v501_v33, 1  ;;  %v1683_v36 = vpop.f32.mrb[2].mxu0  ;;  %v1695_v37 = vpop.f32.mrb[2].mxu1 }
 0x16a   : > { %v519_v39 = vrot.slane %v1683_v36, 1  ;;  %v531_v40 = vrot.slane %v1695_v37, 1  ;;  %v456_v41 = vpop.f32.mrb[3].mxu0  ;;  %v504_v42 = vpop.f32.mrb[3].mxu1 }
 0x16b   : > { %v517_v43 = vrot.slane %v456_v41, 1  ;;  %v529_v44 = vrot.slane %v504_v42, 1 }
 0x16c   : > { %v547_v45 = vsel %vm534_vm2, %v518_v38, %v519_v39  ;;  %v2445_v46 = vsel %vm534_vm2, %v530_v31, %v531_v40  ;;  %v2449_v47 = vsel %vm534_vm2, %v531_v40, %v516_v34 }
 0x16d   : > { %v549_v48 = vsel %vm534_vm2, %v516_v34, %v517_v43  ;;  %v548_v49 = vsel %vm534_vm2, %v517_v43, %v518_v38  ;;  %v2457_v50 = vsel %vm534_vm2, %v528_v35, %v529_v44  ;;  %v2461_v51 = vsel %vm534_vm2, %v529_v44, %v530_v31 }
 0x16f   : > { %v1686_v52 = vpop.f32.mrb[4].mxu0  ;;  %v1702_v53 = vpop.f32.mrb[4].mxu1 }
 0x170   : > { %v606_v54 = vadd.f32 %v1702_v53, %v547_v45  ;;  %v469_v55 = vpop.f32.mrb[5].mxu0  ;;  %v597_v56 = vpop.f32.mrb[5].mxu1  ;;  %v522_v61 = vrot.slane %v1686_v52, 1 }
 0x171   : > { %v520_v57 = vrot.slane %v469_v55, 1  ;;  %v598_v58 = vadd.f32 %v597_v56, %v549_v48  ;;  %v1687_v59 = vpop.f32.mrb[6].mxu0  ;;  %v1703_v60 = vpop.f32.mrb[6].mxu1 }
 0x172   : > { %v523_v62 = vrot.slane %v1687_v59, 1  ;;  %v472_v63 = vpop.f32.mrb[7].mxu0  ;;  %v600_v0 = vpop.f32.mrb[7].mxu1 }
 0x173   : > { %v546_v1 = vsel %vm534_vm2, %v519_v39, %v520_v57  ;;  %v521_v2 = vrot.slane %v472_v63, 1  ;;  %v601_v3 = vadd.f32 %v600_v0, %v548_v49 }
 0x174   : > { %v2465_v4 = vadd.f32 %v1703_v60, %v546_v1  ;;  %v543_v5 = vsel %vm534_vm2, %v522_v61, %v523_v62 }
 0x175   : > { %v545_v6 = vsel %vm534_vm2, %v520_v57, %v521_v2  ;;  %v544_v7 = vsel %vm534_vm2, %v521_v2, %v522_v61 }
 0x177   : > { %v1690_v8 = vpop.f32.mrb[8].mxu0  ;;  %v1706_v9 = vpop.f32.mrb[8].mxu1 }
 0x178   : > { %v622_v10 = vadd.f32 %v1706_v9, %v543_v5  ;;  %v485_v11 = vpop.f32.mrb[9].mxu0  ;;  %v613_v12 = vpop.f32.mrb[9].mxu1  ;;  %v526_v17 = vrot.slane %v1690_v8, 1 }
 0x179   : > { %v524_v13 = vrot.slane %v485_v11, 1  ;;  %v614_v14 = vadd.f32 %v613_v12, %v545_v6  ;;  %v1691_v15 = vpop.f32.mrb[10].mxu0  ;;  %v1707_v16 = vpop.f32.mrb[10].mxu1 }
 0x17a   : > { %v527_v18 = vrot.slane %v1691_v15, 1  ;;  %v488_v19 = vpop.f32.mrb[11].mxu0  ;;  %v616_v20 = vpop.f32.mrb[11].mxu1 }
 0x17b   : > { %v542_v21 = vsel %vm534_vm2, %v523_v62, %v524_v13  ;;  %v525_v22 = vrot.slane %v488_v19, 1  ;;  %v617_v23 = vadd.f32 %v616_v20, %v544_v7 }
 0x17c   : > { %v2475_v24 = vadd.f32 %v1707_v16, %v542_v21  ;;  %v539_v25 = vsel %vm534_vm2, %v526_v17, %v527_v18  ;;  %v538_v26 = vsel %vm534_vm2, %v527_v18, %v528_v35 }
 0x17d   : > { %v541_v27 = vsel %vm534_vm2, %v524_v13, %v525_v22  ;;  %v540_v29 = vsel %vm534_vm2, %v525_v22, %v526_v17 }
 0x17f   : > { %v1710_v30 = vpop.f32.mrb[12].mxu1  ;;  %v1722_v31 = vpop.f32.mrb[12].mxu0 }
 0x180   : > { %v2485_v32 = vadd.f32 %v1710_v30, %v539_v25  ;;  %v629_v33 = vpop.f32.mrb[13].mxu1  ;;  %v2487_v34 = vpop.f32.mrb[13].mxu0  ;;  %v776_v35 = vrot.slane %v1722_v31, 2 }
 0x181   : > { %v2489_v36 = vadd.f32 %v629_v33, %v541_v27  ;;  %v1711_v37 = vpop.f32.mrb[14].mxu1  ;;  %v1723_v38 = vpop.f32.mrb[14].mxu0  ;;  %v774_v43 = vrot.slane %v2487_v34, 2 }
 0x182   : > { %v2492_v39 = vadd.f32 %v1711_v37, %v538_v26  ;;  %v777_v40 = vrot.slane %v1723_v38, 2  ;;  %v632_v41 = vpop.f32.mrb[15].mxu1  ;;  %v714_v42 = vpop.f32.mrb[15].mxu0 }
 0x183   : > { %v633_v44 = vadd.f32 %v632_v41, %v540_v29  ;;  %v775_v45 = vrot.slane %v714_v42, 2 }
 0x184   : > { %v803_v48 = vsel %vm790_vm3, %v776_v35, %v777_v40 }
 0x185   : > { %v809_v49 = vadd.f32 %v803_v48, %v606_v54  ;;  %v804_v52 = vsel %vm790_vm3, %v775_v45, %v776_v35  ;;  %v805_v53 = vsel %vm790_vm3, %v774_v43, %v775_v45 }
 0x186   : > { %v807_v55 = vadd.f32 %v805_v53, %v598_v58  ;;  %v808_v56 = vadd.f32 %v804_v52, %v601_v3 }
 0x187   : > { %v1714_v57 = vpop.f32.mrb[16].mxu1  ;;  %v1726_v59 = vpop.f32.mrb[16].mxu0 }
 0x188   : > { %v2504_v60 = vadd.f32 %v1714_v57, %v2445_v46  ;;  %v645_v61 = vpop.f32.mrb[17].mxu1  ;;  %v727_v62 = vpop.f32.mrb[17].mxu0  ;;  %v780_v2 = vrot.slane %v1726_v59, 2 }
 0x189   : > { %v2507_v63 = vadd.f32 %v645_v61, %v2457_v50  ;;  %v778_v54 = vrot.slane %v727_v62, 2  ;;  %v1715_v0 = vpop.f32.mrb[18].mxu1  ;;  %v1727_v1 = vpop.f32.mrb[18].mxu0 }
 0x18a   : > { %v2510_v5 = vadd.f32 %v1715_v0, %v2449_v47  ;;  %v781_v6 = vrot.slane %v1727_v1, 2  ;;  %v648_v58 = vpop.f32.mrb[19].mxu1  ;;  %v730_v3 = vpop.f32.mrb[19].mxu0 }
 0x18b   : > { %v802_v7 = vsel %vm790_vm3, %v777_v40, %v778_v54  ;;  %v2515_v46 = vadd.f32 %v648_v58, %v2461_v51  ;;  %v779_v8 = vrot.slane %v730_v3, 2 }
 0x18c   : > { %v810_v50 = vadd.f32 %v802_v7, %v2465_v4  ;;  %v799_v9 = vsel %vm790_vm3, %v780_v2, %v781_v6 }
 0x18d   : > { %v2520_v11 = vadd.f32 %v799_v9, %v622_v10  ;;  %v800_v47 = vsel %vm790_vm3, %v779_v8, %v780_v2  ;;  %v801_v12 = vsel %vm790_vm3, %v778_v54, %v779_v8 }
 0x18e   : > { %v2526_v13 = vadd.f32 %v801_v12, %v614_v14  ;;  %v2528_v15 = vadd.f32 %v800_v47, %v617_v23 }
 0x18f   : > { %v1730_v51 = vpop.f32.mrb[20].mxu0  ;;  %v1742_v16 = vpop.f32.mrb[20].mxu1 }
 0x190   : > { %v939_v17 = vrot.slane %v1742_v16, 3  ;;  %v743_v18 = vpop.f32.mrb[21].mxu0  ;;  %v2530_v4 = vpop.f32.mrb[21].mxu1  ;;  %v784_v21 = vrot.slane %v1730_v51, 2 }
 0x191   : > { %v782_v19 = vrot.slane %v743_v18, 2  ;;  %v1731_v20 = vpop.f32.mrb[22].mxu0  ;;  %v1743_v10 = vpop.f32.mrb[22].mxu1  ;;  %v937_v22 = vrot.slane %v2530_v4, 3 }
 0x192   : > { %v785_v25 = vrot.slane %v1731_v20, 2  ;;  %v940_v26 = vrot.slane %v1743_v10, 3  ;;  %v746_v14 = vpop.f32.mrb[23].mxu0  ;;  %v877_v27 = vpop.f32.mrb[23].mxu1 }
 0x193   : > { %v798_v23 = vsel %vm790_vm3, %v781_v6, %v782_v19  ;;  %v783_v29 = vrot.slane %v746_v14, 2  ;;  %v938_v30 = vrot.slane %v877_v27, 3 }
 0x194   : > { %v2537_v31 = vadd.f32 %v798_v23, %v2475_v24  ;;  %v795_v33 = vsel %vm790_vm3, %v784_v21, %v785_v25  ;;  %v966_v37 = vsel %vm953_vm4, %v939_v17, %v940_v26 }
 0x195   : > { %v2544_v38 = vadd.f32 %v795_v33, %v2485_v32  ;;  %v2546_v35 = vadd.f32 %v966_v37, %v809_v49  ;;  %v796_v40 = vsel %vm790_vm3, %v783_v29, %v784_v21  ;;  %v797_v41 = vsel %vm790_vm3, %v782_v19, %v783_v29 }
 0x196   : > { %v2553_v24 = vadd.f32 %v797_v41, %v2489_v36  ;;  %v2555_v42 = vadd.f32 %v796_v40, %v633_v44  ;;  %v967_v45 = vsel %vm953_vm4, %v938_v30, %v939_v17  ;;  %v968_v32 = vsel %vm953_vm4, %v937_v22, %v938_v30 }
 0x197   : > { %v2563_v48 = vadd.f32 %v968_v32, %v807_v55  ;;  %v2565_v49 = vadd.f32 %v967_v45, %v808_v56  ;;  %v1734_v52 = vpop.f32.mrb[24].mxu0  ;;  %v1746_v53 = vpop.f32.mrb[24].mxu1 }
 0x198   : > { %v759_v57 = vpop.f32.mrb[25].mxu0  ;;  %v890_v59 = vpop.f32.mrb[25].mxu1  ;;  %v943_v36 = vrot.slane %v1746_v53, 3  ;;  %v788_v0 = vrot.slane %v1734_v52, 2  ;;  %v2629_v52 = vld [vmem:[%s2819_s2] ss:$0 sm:$0xff] }
 0x199   : > { %v786_v61 = vrot.slane %v759_v57, 2  ;;  %v941_v44 = vrot.slane %v890_v59, 3  ;;  %v1735_v62 = vpop.f32.mrb[26].mxu0  ;;  %v1747_v54 = vpop.f32.mrb[26].mxu1 }
 0x19a   : > { %v789_v1 = vrot.slane %v1735_v62, 2  ;;  %v944_v2 = vrot.slane %v1747_v54, 3  ;;  %v762_v6 = vpop.f32.mrb[27].mxu0  ;;  %v893_v58 = vpop.f32.mrb[27].mxu1 }
 0x19b   : > { %v794_v55 = vsel %vm790_vm3, %v785_v25, %v786_v61  ;;  %v965_v56 = vsel %vm953_vm4, %v940_v26, %v941_v44  ;;  %v787_v3 = vrot.slane %v762_v6, 2  ;;  %v942_v7 = vrot.slane %v893_v58, 3  ;;  %v2654_v6 = vld [vmem:[#allocation7] sm:$0xff] }
 0x19c   : > { %v2572_v8 = vadd.f32 %v794_v55, %v2492_v39  ;;  %v2574_v9 = vadd.f32 %v965_v56, %v810_v50  ;;  %v791_v47 = vsel %vm790_vm3, %v788_v0, %v789_v1  ;;  %v806_v12 = vsel %vm790_vm3, %v789_v1, %v774_v43  ;;  %v2658_v56 = vld [vmem:[#allocation7 + $0x8] sm:$0xff] }
 0x19d   : > { %v2583_v51 = vadd.f32 %v791_v47, %v2504_v60  ;;  %v2586_v16 = vadd.f32 %v806_v12, %v2510_v5  ;;  %v962_v39 = vsel %vm953_vm4, %v943_v36, %v944_v2  ;;  %v792_v50 = vsel %vm790_vm3, %v787_v3, %v788_v0 }
 0x19e   : > { %v2593_v17 = vadd.f32 %v962_v39, %v2520_v11  ;;  %v793_v34 = vsel %vm790_vm3, %v786_v61, %v787_v3  ;;  %v2598_v43 = vadd.f32 %v792_v50, %v2515_v46  ;;  %v963_v60 = vsel %vm953_vm4, %v942_v7, %v943_v36 }
 0x19f   : > { %v2603_v5 = vadd.f32 %v793_v34, %v2507_v63  ;;  %v964_v18 = vsel %vm953_vm4, %v941_v44, %v942_v7  ;;  %v2608_v19 = vadd.f32 %v963_v60, %v2528_v15  ;;  %v1750_v11 = vpop.f32.mrb[28].mxu1  ;;  %v1762_v20 = vpop.f32.mrb[28].mxu0 }
 0x1a0   : > { %v2611_v10 = vadd.f32 %v964_v18, %v2526_v13  ;;  %v947_v21 = vrot.slane %v1750_v11, 3  ;;  %v906_v46 = vpop.f32.mrb[29].mxu1  ;;  %v2613_v25 = vpop.f32.mrb[29].mxu0  ;;  %v1102_v63 = vrot.slane %v1762_v20, 4 }
 0x1a1   : > { %v945_v26 = vrot.slane %v906_v46, 3  ;;  %v1751_v14 = vpop.f32.mrb[30].mxu1  ;;  %v1763_v27 = vpop.f32.mrb[30].mxu0  ;;  %v1100_v41 = vrot.slane %v2613_v25, 4 }
 0x1a2   : > { %v948_v23 = vrot.slane %v1751_v14, 3  ;;  %v1103_v29 = vrot.slane %v1763_v27, 4  ;;  %v909_v30 = vpop.f32.mrb[31].mxu1  ;;  %v1040_v15 = vpop.f32.mrb[31].mxu0 }
 0x1a3   : > { %v961_v33 = vsel %vm953_vm4, %v944_v2, %v945_v26  ;;  %v946_v37 = vrot.slane %v909_v30, 3  ;;  %v1101_v13 = vrot.slane %v1040_v15, 4 }
 0x1a4   : > { %v2619_v40 = vadd.f32 %v961_v33, %v2537_v31  ;;  %v958_v45 = vsel %vm953_vm4, %v947_v21, %v948_v23  ;;  %v1129_v32 = vsel %vm1116_vm5, %v1102_v63, %v1103_v29 }
 0x1a5   : > { %v2632_v53 = vadd.f32 %v958_v45, %v2544_v38  ;;  %v1135_v57 = vadd.f32 %v1129_v32, %v2546_v35  ;;  %v959_v31 = vsel %vm953_vm4, %v946_v37, %v947_v21  ;;  %v960_v59 = vsel %vm953_vm4, %v945_v26, %v946_v37 }
 0x1a6   : > { %v2640_v36 = vadd.f32 %v960_v59, %v2553_v24  ;;  %v2643_v61 = vadd.f32 %v959_v31, %v2555_v42  ;;  %v1130_v44 = vsel %vm1116_vm5, %v1101_v13, %v1102_v63  ;;  %v1131_v38 = vsel %vm1116_vm5, %v1100_v41, %v1101_v13 }
 0x1a7   : > { %v1158_v35 = vadd.f32 %v2629_v52, %v1135_v57  ;;  %v1133_v62 = vadd.f32 %v1131_v38, %v2563_v48  ;;  %v1134_v54 = vadd.f32 %v1130_v44, %v2565_v49  ;;  %v1754_v0 = vpop.f32.mrb[32].mxu1  ;;  %v1766_v24 = vpop.f32.mrb[32].mxu0 }
 0x1a8   : > { %v951_v1 = vrot.slane %v1754_v0, 3  ;;  %v922_v2 = vpop.f32.mrb[33].mxu1  ;;  %v1053_v42 = vpop.f32.mrb[33].mxu0  ;;  %v1106_v12 = vrot.slane %v1766_v24, 4 }
 0x1a9   : > { %v1156_v58 = vadd.f32 %v2629_v52, %v1133_v62  ;;  %v1157_v55 = vadd.f32 %v2629_v52, %v1134_v54  ;;  %v949_v3 = vrot.slane %v922_v2, 3  ;;  %v1755_v7 = vpop.f32.mrb[34].mxu1  ;;  %v1767_v47 = vpop.f32.mrb[34].mxu0  ;;  %v1104_v48 = vrot.slane %v1053_v42, 4 }
 0x1aa   : > { %v952_v39 = vrot.slane %v1755_v7, 3  ;;  %v1107_v49 = vrot.slane %v1767_v47, 4  ;;  %v925_v50 = vpop.f32.mrb[35].mxu1  ;;  %v1056_v34 = vpop.f32.mrb[35].mxu0  ;;  %v1174_v60 = vmax.f32 %v1158_v35, 0.0 }
 0x1ab   : > { %v1172_v18 = vmax.f32 %v1156_v58, 0.0  ;;  %v1173_v11 = vmax.f32 %v1157_v55, 0.0  ;;  %v957_v20 = vsel %vm953_vm4, %v948_v23, %v949_v3  ;;  %v1128_v46 = vsel %vm1116_vm5, %v1103_v29, %v1104_v48 }
 0x1ac   : > { %v2663_v21 = vadd.f32 %v957_v20, %v2572_v8  ;;  %v954_v26 = vsel %vm953_vm4, %v951_v1, %v952_v39  ;;  %v969_v14 = vsel %vm953_vm4, %v952_v39, %v937_v22  ;;  %v1136_v23 = vadd.f32 %v1128_v46, %v2574_v9 }
 0x1ad   : > { %v1190_v27 = vmul.f32 %v2654_v6, %v1172_v18  ;;  %v1191_v63 = vmul.f32 %v2658_v56, %v1173_v11  ;;  %v2677_v8 = vadd.f32 %v954_v26, %v2583_v51  ;;  %v2680_v30 = vadd.f32 %v969_v14, %v2586_v16 }
 0x1ae   : > { %v1125_v29 = vsel %vm1116_vm5, %v1106_v12, %v1107_v49  ;;  %v950_v15 = vrot.slane %v925_v50, 3  ;;  %v1105_v4 = vrot.slane %v1056_v34, 4  ;;  %v1159_v22 = vadd.f32 %v2629_v52, %v1136_v23 }
 0x1af   : > { %v1206_v33 = vmax.f32 %v1190_v27, %v1191_v63  ;;  %v1139_v37 = vadd.f32 %v1125_v29, %v2593_v17  ;;  %v1770_v13 = vpop.f32.mrb[36].mxu0  ;;  %v1192_v38 = vmul.f32 %v2654_v6, %v1174_v60 }
 0x1b0   : > { %v955_v9 = vsel %vm953_vm4, %v950_v15, %v951_v1  ;;  %v956_v51 = vsel %vm953_vm4, %v949_v3, %v950_v15  ;;  %v1126_v16 = vsel %vm1116_vm5, %v1105_v4, %v1106_v12  ;;  %v1127_v45 = vsel %vm1116_vm5, %v1104_v48, %v1105_v4  ;;  %v1069_v32 = vpop.f32.mrb[37].mxu0 }
 0x1b1   : > { %v1207_v57 = vrot.slane %v1206_v33, 4  ;;  %v1175_v31 = vmax.f32 %v1159_v22, 0.0  ;;  %v1162_v59 = vadd.f32 %v2629_v52, %v1139_v37  ;;  %v2696_v17 = vadd.f32 %v956_v51, %v2603_v5  ;;  %v1771_v44 = vpop.f32.mrb[38].mxu0 }
 0x1b2   : > { %v2700_v35 = vadd.f32 %v955_v9, %v2598_v43  ;;  %v1137_v62 = vadd.f32 %v1127_v45, %v2611_v10  ;;  %v1138_v54 = vadd.f32 %v1126_v16, %v2608_v19  ;;  %v1072_v0 = vpop.f32.mrb[39].mxu0  ;;  %v1110_v2 = vrot.slane %v1770_v13, 4 }
 0x1b3   : > { %v1208_v24 = vmax.f32 %v1206_v33, %v1207_v57  ;;  %v1193_v1 = vmul.f32 %v2658_v56, %v1175_v31  ;;  %v1108_v42 = vrot.slane %v1069_v32, 4  ;;  %v1111_v55 = vrot.slane %v1771_v44, 4 }
 0x1b4   : > { %v1160_v58 = vadd.f32 %v2629_v52, %v1137_v62  ;;  %v1161_v5 = vadd.f32 %v2629_v52, %v1138_v54  ;;  %v1109_v3 = vrot.slane %v1072_v0, 4  ;;  %v1178_v43 = vmax.f32 %v1162_v59, 0.0 }
 0x1b5   : > { %v1209_v7 = vrot.slane %v1208_v24, 2  ;;  %v1213_v47 = vmax.f32 %v1192_v38, %v1193_v1  ;;  %v1124_v10 = vsel %vm1116_vm5, %v1107_v49, %v1108_v42  ;;  %v1121_v39 = vsel %vm1116_vm5, %v1110_v2, %v1111_v55 }
 0x1b6   : > { %v1176_v12 = vmax.f32 %v1160_v58, 0.0  ;;  %v1177_v19 = vmax.f32 %v1161_v5, 0.0  ;;  %v1140_v48 = vadd.f32 %v1124_v10, %v2619_v40  ;;  %v1143_v60 = vadd.f32 %v1121_v39, %v2632_v53 }
 0x1b7   : > { %v1210_v50 = vmax.f32 %v1208_v24, %v1209_v7  ;;  %v1214_v34 = vrot.slane %v1213_v47, 4  ;;  %v1122_v18 = vsel %vm1116_vm5, %v1109_v3, %v1110_v2  ;;  %v2715_v11 = vpop.f32.mrb[40].mxu0  ;;  %v1123_v40 = vsel %vm1116_vm5, %v1108_v42, %v1109_v3 }
 0x1b8   : > { %v1194_v20 = vmul.f32 %v2654_v6, %v1176_v12  ;;  %v1195_v49 = vmul.f32 %v2658_v56, %v1177_v19  ;;  %v1163_v46 = vadd.f32 %v2629_v52, %v1140_v48  ;;  %v2722_v26 = vpop.f32.mrb[41].mxu0  ;;  %v1166_v53 = vadd.f32 %v2629_v52, %v1143_v60 }
 0x1b9   : > { %v1211_v14 = vrot.slane %v1210_v50, 1  ;;  %v1215_v27 = vmax.f32 %v1213_v47, %v1214_v34  ;;  %v1141_v63 = vadd.f32 %v1123_v40, %v2640_v36  ;;  %v1775_v23 = vpop.f32.mrb[42].mxu0  ;;  %v1196_v29 = vmul.f32 %v2654_v6, %v1178_v43 }
 0x1ba   : > { %v1220_v15 = vmax.f32 %v1194_v20, %v1195_v49  ;;  %v1179_v4 = vmax.f32 %v1163_v46, 0.0  ;;  %v1142_v33 = vadd.f32 %v1122_v18, %v2643_v61  ;;  %v1088_v22 = vpop.f32.mrb[43].mxu0  ;;  %v1182_v9 = vmax.f32 %v1166_v53, 0.0 }
 0x1bb   : > { %v1212_v37 = vmax.f32 %v1210_v50, %v1211_v14  ;;  %v1216_v13 = vrot.slane %v1215_v27, 2  ;;  %v1164_v51 = vadd.f32 %v2629_v52, %v1141_v63  ;;  %v1112_v36 = vrot.slane %v2722_v26, 4 }
 0x1bc   : > { %v1221_v16 = vrot.slane %v1220_v15, 4  ;;  %v1197_v45 = vmul.f32 %v2658_v56, %v1179_v4  ;;  %v1165_v32 = vadd.f32 %v2629_v52, %v1142_v33  ;;  %v1114_v44 = vrot.slane %v2715_v11, 4 }
 0x1bd   : > { %v1262_v57 = vpack.c.bf16 %v1212_v37, %v1212_v37  ;;  %v1217_v31 = vmax.f32 %v1215_v27, %v1216_v13  ;;  %v1180_v59 = vmax.f32 %v1164_v51, 0.0  ;;  %v1120_v54 = vsel %vm1116_vm5, %v1111_v55, %v1112_v36 }
 0x1be   : > { %v1222_v61 = vmax.f32 %v1220_v15, %v1221_v16  ;;  %v1227_v38 = vmax.f32 %v1196_v29, %v1197_v45  ;;  %v1181_v62 = vmax.f32 %v1165_v32, 0.0  ;;  %v1200_v24 = vmul.f32 %v2654_v6, %v1182_v9 }
 0x1bf   : > { %v1218_v0 = vrot.slane %v1217_v31, 1  ;;  %v1198_v1 = vmul.f32 %v2654_v6, %v1180_v59  ;;  %v1144_v2 = vadd.f32 %v1120_v54, %v2663_v21  ;;  %v1115_v3 = vrot.slane %v1775_v23, 4 }
 0x1c0   : > { %v1223_v42 = vrot.slane %v1222_v61, 2  ;;  %v1228_v58 = vrot.slane %v1227_v38, 4  ;;  %v1199_v5 = vmul.f32 %v2658_v56, %v1181_v62  ;;  %v1301_v7 = vunpack.c.l.b16 %v1262_v57 }
 0x1c1   : > { %v1219_v47 = vmax.f32 %v1217_v31, %v1218_v0  ;;  %v1167_v43 = vadd.f32 %v2629_v52, %v1144_v2  ;;  %v1113_v10 = vrot.slane %v1088_v22, 4  ;;  %v1117_v48 = vsel %vm1116_vm5, %v1114_v44, %v1115_v3 }
 0x1c2   : > { %v1224_v12 = vmax.f32 %v1222_v61, %v1223_v42  ;;  %v1229_v55 = vmax.f32 %v1227_v38, %v1228_v58  ;;  %v1234_v19 = vmax.f32 %v1198_v1, %v1199_v5  ;;  %v1132_v21 = vsel %vm1116_vm5, %v1115_v3, %v1100_v41 }
 0x1c3   : > { %v1263_v39 = vpack.c.bf16 %v1219_v47, %v1219_v47  ;;  %v1183_v50 = vmax.f32 %v1167_v43, 0.0  ;;  %v1147_v34 = vadd.f32 %v1117_v48, %v2677_v8  ;;  %v1148_v20 = vadd.f32 %v1132_v21, %v2680_v30 }
 0x1c4   : > { %v1225_v60 = vrot.slane %v1224_v12, 1  ;;  %v1230_v18 = vrot.slane %v1229_v55, 2  ;;  %v1235_v11 = vrot.slane %v1234_v19, 4  ;;  %v1118_v26 = vsel %vm1116_vm5, %v1113_v10, %v1114_v44 }
 0x1c5   : > { %v1302_v49 = vunpack.c.l.b16 %v1263_v39  ;;  %v1201_v46 = vmul.f32 %v2658_v56, %v1183_v50  ;;  %v1170_v40 = vadd.f32 %v2629_v52, %v1147_v34  ;;  %v1171_v41 = vadd.f32 %v2629_v52, %v1148_v20 }
 0x1c6   : > { %v1226_v14 = vmax.f32 %v1224_v12, %v1225_v60  ;;  %v1231_v25 = vmax.f32 %v1229_v55, %v1230_v18  ;;  %v1236_v27 = vmax.f32 %v1234_v19, %v1235_v11  ;;  %v1119_v30 = vsel %vm1116_vm5, %v1112_v36, %v1113_v10 }
 0x1c7   : > { %v1310_v8 = vsel %vm1309_vm6, %v1302_v49, %v1301_v7  ;;  %v1241_v53 = vmax.f32 %v1200_v24, %v1201_v46  ;;  %v1186_v63 = vmax.f32 %v1170_v40, 0.0  ;;  %v1187_v4 = vmax.f32 %v1171_v41, 0.0 }
 0x1c8   : > { %v1264_v23 = vpack.c.bf16 %v1226_v14, %v1226_v14  ;;  %v1232_v29 = vrot.slane %v1231_v25, 1  ;;  %v1237_v15 = vrot.slane %v1236_v27, 2  ;;  %v1145_v37 = vadd.f32 %v1119_v30, %v2696_v17  ;;  %v1602_v14 = vld [vmem:[%s2822_s5] ss:$0 sm:$0xff] }
 0x1c9   : > { %v1242_v33 = vrot.slane %v1241_v53, 4  ;;  %v1204_v22 = vmul.f32 %v2654_v6, %v1186_v63  ;;  %v1146_v13 = vadd.f32 %v1118_v26, %v2700_v35  ;;  %v1205_v45 = vmul.f32 %v2658_v56, %v1187_v4 }
 0x1ca   : > { %v1303_v9 = vunpack.c.l.b16 %v1264_v23  ;;  %v1233_v51 = vmax.f32 %v1231_v25, %v1232_v29  ;;  %v1238_v16 = vmax.f32 %v1236_v27, %v1237_v15  ;;  %v1168_v28 = vadd.f32 %v2629_v52, %v1145_v37 }
 0x1cb   : > { %v1243_v32 = vmax.f32 %v1241_v53, %v1242_v33  ;;  %v1169_v36 = vadd.f32 %v2629_v52, %v1146_v13  ;;  %v1255_v59 = vmax.f32 %v1204_v22, %v1205_v45 }
 0x1cc   : > { %v1265_v57 = vpack.c.bf16 %v1233_v51, %v1233_v51  ;;  %v1239_v31 = vrot.slane %v1238_v16, 1  ;;  %v1312_v44 = vsel %vm1311_vm7, %v1303_v9, %v1310_v8  ;;  %v1184_v38 = vmax.f32 %v1168_v28, 0.0 }
 0x1cd   : > { %v1244_v61 = vrot.slane %v1243_v32, 2  ;;  %v1185_v17 = vmax.f32 %v1169_v36, 0.0  ;;  %v1256_v54 = vrot.slane %v1255_v59, 4 }
 0x1ce   : > { %v1304_v35 = vunpack.c.l.b16 %v1265_v57  ;;  %v1240_v62 = vmax.f32 %v1238_v16, %v1239_v31  ;;  %v1202_v24 = vmul.f32 %v2654_v6, %v1184_v38 }
 0x1cf   : > { %v1245_v0 = vmax.f32 %v1243_v32, %v1244_v61  ;;  %v1203_v1 = vmul.f32 %v2658_v56, %v1185_v17  ;;  %v1257_v42 = vmax.f32 %v1255_v59, %v1256_v54 }
 0x1d0   : > { %v1266_v2 = vpack.c.bf16 %v1240_v62, %v1240_v62  ;;  %v1314_v52 = vsel %vm1313_vm8, %v1304_v35, %v1312_v44 }
 0x1d1   : > { %v1246_v58 = vrot.slane %v1245_v0, 1  ;;  %v1248_v5 = vmax.f32 %v1202_v24, %v1203_v1  ;;  %v1258_v7 = vrot.slane %v1257_v42, 2 }
 0x1d2   : > { %v1305_v3 = vunpack.c.l.b16 %v1266_v2 }
 0x1d3   : > { %v1247_v47 = vmax.f32 %v1245_v0, %v1246_v58  ;;  %v1249_v43 = vrot.slane %v1248_v5, 4  ;;  %v1259_v10 = vmax.f32 %v1257_v42, %v1258_v7 }
 0x1d4   : > { %v1316_v12 = vsel %vm1315_vm9, %v1305_v3, %v1314_v52 }
 0x1d5   : > { %v1267_v55 = vpack.c.bf16 %v1247_v47, %v1247_v47  ;;  %v1250_v19 = vmax.f32 %v1248_v5, %v1249_v43  ;;  %v1260_v48 = vrot.slane %v1259_v10, 1 }
 0x1d7   : > { %v1306_v39 = vunpack.c.l.b16 %v1267_v55  ;;  %v1251_v6 = vrot.slane %v1250_v19, 2  ;;  %v1261_v21 = vmax.f32 %v1259_v10, %v1260_v48 }
 0x1d9   : > { %v1252_v56 = vmax.f32 %v1250_v19, %v1251_v6  ;;  %v1318_v50 = vsel %vm1317_vm10, %v1306_v39, %v1316_v12  ;;  %v1269_v18 = vpack.c.bf16 %v1261_v21, %v1261_v21 }
 0x1db   : > { %v1253_v34 = vrot.slane %v1252_v56, 1  ;;  %v1308_v49 = vunpack.c.l.b16 %v1269_v18 }
 0x1dd   : > { %v1254_v60 = vmax.f32 %v1252_v56, %v1253_v34 }
 0x1df   : > { %v1268_v11 = vpack.c.bf16 %v1254_v60, %v1254_v60 }
 0x1e1   : > { %v1307_v20 = vunpack.c.l.b16 %v1268_v11 }
 0x1e3   : > { %v1320_v46 = vsel %vm1319_vm11, %v1307_v20, %v1318_v50 }
 0x1e4   : > { %v1322_v40 = vsel %vm1321_vm12, %v1308_v49, %v1320_v46 }
 0x1e5   : > { %v1323_v26 = vpack.c.b16 %v1322_v40, %v1322_v40 }
 0x1e7   : > { %1793 = vmatmul.mubr.bf16.vlgmr.msra.gmra.mrb[36].mxu1 %v1323_v26 }
 0x2ba   : > { %v1407_v25 = vpop.f32.mrb[36].mxu1 }
 0x2bb   : > { %v1408_v27 = vadd.f32 %v1602_v14, %v1407_v25  ;;  %v1794_v41 = vpop.f32.mrb[37].mxu1 }
 0x2bc   : > { %v1410_v8 = vpop.f32.mrb[38].mxu1 }
 0x2bd   : > { %1413 = vst [vmem:[%s314_s1] sm:$0xff] %v1408_v27  ;;  %v1795_v53 = vpop.f32.mrb[39].mxu1 }
 0x2be   : > { %2036 = shalt.err (!%p2033_p4)
}
 0x2bf   : > { %s2037_s16 = scalar_lea.hbm %s2773_s8, 128  ;;  %s2041_s20 = scalar_lea.hbm %s2823_s6, 256 }
 0x2c0   : > { %p2038_p9 = scmp.ne.s32.totalorder %s2773_s8, %s2037_s16  ;;  %p2042_p8 = scmp.lt.u32.totalorder %s2773_s8, %s2823_s6 }
 0x2c1   : > { %p2043_p13 = scmp.lt.u32.totalorder %s2041_s20, %s2037_s16  ;;  %p2045_p10 = scmp.lt.u32.totalorder %s2037_s16, %s2773_s8 }
 0x2c2   : > { %p2039_p0 = pnand %p2038_p9, %p2293_p5 }
 0x2c3   : > { %p2044_p6 = por %p2043_p13, %p2042_p8 }
 0x2c4   : > { %p2040_p11 = pneg %p2039_p0 }
 0x2c5   : > { %p2046_p3 = por %p2045_p10, %p2044_p6 }
 0x2c7   : > { %p2047_p7 = pnand %p2046_p3, %p2040_p11 }
 0x2c9   : > { %2050 = shalt.err (!%p2047_p7)
}
 0x2ca   : > { %1814 = dma.vmem_to_hbm [thread:$0]  (%p2293_p5), %s2775_s26, 128, %s2773_s8, %s1415_s12  }
 0x2cb PF: > { %s1440_s10 = sand.u32 1, %s2085_s21   ;;  %p2849_p12 = scmp.ne.s32.totalorder %s2833_s28, 0 }
 0x2cc   : > { %p2850_p1 = scmp.ge.s32.totalorder %s2097_s24, 2  ;;  %s1441_s1 = scalar_lea.sflag [#allocation4], %s1440_s10 }
 0x2ce   : > { %p1831_p2 = pnand %p2850_p1, %p2849_p12 }
 0x2d0   : > { %2080 = dma.done.wait (!%p1831_p2), %s1441_s1, 128  }
 0x2d1   : > { %2082 = vsyncadd (!%p1831_p2), %s1441_s1, 4294967168  ;;  %p21_p4 = scmp.ge.s32.totalorder %s2258_s14, 4   ;;  %s2851_s21 = smov %s2089_s22 }
 0x2d2   : > { %s2852_s22 = smov %s2093_s23  ;;  %s2853_s23 = smov %s2289_s30 }
 0x2d3   : > { %s2854_s24 = smov %s2258_s14  ;;  %23 = sbr.rel (!%p21_p4) target bundleno = 9 (0x9), region = 105 }
 0x2da   :  { %1446 = vsyncpa [#allocation3], 1 }
 0x2db   :  { %1448 = vsyncpa [#allocation3 + $0x1], 1 }
 0x2dc   :  { %1449 = vsyncpa [#allocation6], 1 }
 0x2dd   :  { %1450 = vsyncpa [#allocation9], 1 }
 0x2de   :  { %1451 = vsyncpa [#allocation4], 1 }
 0x2df   :  { %1453 = vsyncpa [#allocation4 + $0x1], 1 }

</bundles_post_ra>
